<compile_context>
chip_gen: v7x
topology: tpu7x:2x2x1
jax: 0.10.0
libtpu: 0.0.40
codegen_flags: <defaults>
</compile_context>

<pallas_src>
import jax
import jax.numpy as jnp
from jax.experimental import pallas as pl
from jax.experimental.pallas import tpu as pltpu


def _make_chamfer_kernel(n_real, n_pad, ty, tx, bt):
    needs_mask = (n_pad != n_real)   # static: padding present?
    n_cols = tx // 128

    def kernel(x_ref, y_ref, o_ref, miny_ref, minx_ref, acc_ref):
        # x_ref   : (bt, 3, tx)     x tile, coord-major (lane-dense)
        # y_ref   : (bt, ty, 3)     y tile, point-major
        # o_ref   : (1, bt, 1)      per-batch losses (written once, at the very end)
        # miny_ref: (bt, ty, 128)   per-lane-column running min_j d2 (over ix)
        # minx_ref: (bt, 1, n_pad)  running min_i d2 for every x point   (over iy)
        # acc_ref : (bt, 1, 1)      running y-direction partial loss
        iy = pl.program_id(1)
        ix = pl.program_id(2)
        n_iy = pl.num_programs(1)
        n_ix = pl.num_programs(2)
        x_start = pl.multiple_of(ix * tx, tx)

        @pl.when(jnp.logical_and(iy == 0, ix == 0))
        def _():
            acc_ref[...] = jnp.zeros_like(acc_ref)

        for bb in range(bt):  # bt <= 2: small, bounded static unroll
            x_t = x_ref[bb]   # (3, tx)
            y_p = y_ref[bb]   # (ty, 3)

            # ---- squared distances on the VPU (no MXU, no cancellation) ----
            # d2[i, j] = sum_k (x[k, j] - y[i, k])^2; x_k is a (1, tx) row,
            # y_k a (ty, 1) column -> pure broadcasted VALU work.
            d = x_t[0:1, :] - y_p[:, 0:1]
            d2 = d * d
            d = x_t[1:2, :] - y_p[:, 1:2]
            d2 = d2 + d * d
            d = x_t[2:3, :] - y_p[:, 2:3]
            d2 = d2 + d * d                                   # (ty, tx) f32

            # ---- y-direction: per-lane-column running min over x tiles ----
            # Elementwise minimum over the tx/128 lane columns only; the single
            # cross-lane XLU reduce is deferred to the last x tile.
            col_min = d2[:, 0:128]
            for c in range(1, n_cols):
                col_min = jnp.minimum(col_min, d2[:, c * 128:(c + 1) * 128])

            @pl.when(ix == 0)
            def _():
                miny_ref[bb] = col_min

            @pl.when(ix != 0)
            def _():
                miny_ref[bb] = jnp.minimum(miny_ref[bb], col_min)

            # ---- x-direction: running min over y tiles ----
            tile_min_y = jnp.min(d2, axis=0, keepdims=True)   # (1, tx)

            @pl.when(iy == 0)
            def _():
                minx_ref[bb, :, pl.ds(x_start, tx)] = tile_min_y

            @pl.when(iy != 0)
            def _():
                prev = minx_ref[bb, :, pl.ds(x_start, tx)]
                minx_ref[bb, :, pl.ds(x_start, tx)] = jnp.minimum(prev, tile_min_y)

            # ---- y tile finished: one XLU reduce, sqrt only ty winners ----
            @pl.when(ix == n_ix - 1)
            def _():
                m = jnp.min(miny_ref[bb], axis=-1, keepdims=True)     # (ty, 1)
                vals = jnp.sqrt(1e-6 + m)
                if needs_mask:
                    row = iy * ty + jax.lax.broadcasted_iota(jnp.int32, (ty, 1), 0)
                    vals = jnp.where(row < n_real, vals, 0.0)
                acc_ref[bb] = acc_ref[bb] + jnp.sum(vals, keepdims=True)

            # ---- batch element finished: add x-direction term, single output write ----
            @pl.when(jnp.logical_and(iy == n_iy - 1, ix == n_ix - 1))
            def _():
                vals = jnp.sqrt(1e-6 + minx_ref[bb])                  # (1, n_pad)
                if needs_mask:
                    col = jax.lax.broadcasted_iota(jnp.int32, (1, n_pad), 1)
                    vals = jnp.where(col < n_real, vals, 0.0)
                total = acc_ref[bb] + jnp.sum(vals, keepdims=True)    # (1, 1)
                o_ref[0, bb:bb + 1, :] = total

    return kernel


def _pick_tile(n, target, quantum):
    """Largest divisor of n that is a multiple of `quantum` and <= target.

    n is always a multiple of 128 here, so a valid tile always exists."""
    if n <= target:
        return n
    t = (target // quantum) * quantum
    while t >= quantum:
        if n % t == 0:
            return t
        t -= quantum
    return n


def chamfer_loss(x, y):
    """x, y: (bs, N, 3) float32 point clouds. Returns scalar chamfer loss."""
    bs, n, c = x.shape
    assert c == 3 and y.shape == (bs, n, 3)
    x = x.astype(jnp.float32)
    y = y.astype(jnp.float32)

    # Pad N to a multiple of 128 with large-but-finite sentinel points: they can
    # never win a real point's min, and their own contributions are masked at
    # the (cheap, 1-wide) reduction points inside the kernel.
    n_pad = ((n + 127) // 128) * 128
    if n_pad != n:
        pad = ((0, 0), (0, n_pad - n), (0, 0))
        x = jnp.pad(x, pad, constant_values=1e6)
        y = jnp.pad(y, pad, constant_values=1e6)

    tx = _pick_tile(n_pad, 2048, 128)   # x-point tile (lanes)
    ty = _pick_tile(n_pad, 512, 8)      # y-point tile (sublanes)
    n_ix = n_pad // tx
    n_iy = n_pad // ty

    # Batch blocking: bt <= 2 (bounded vreg live ranges) and keep >= 2 batch
    # blocks whenever bs >= 2 so v7x's two TensorCores both get work.
    cap = 2 if (n_ix == 1 and n_iy == 1) else 1
    cap = min(cap, max(1, bs // 2))
    bt = 2 if (cap >= 2 and bs % 2 == 0) else 1
    num_bb = bs // bt

    x_cm = jnp.transpose(x, (0, 2, 1))   # (bs, 3, n_pad): coord-major, lane-dense
    y_pm = y                             # (bs, n_pad, 3): point-major

    # VMEM budget: d2 slab + elementwise temporaries (~3x tile), running-min
    # scratch, double-buffered input blocks, plus margin.
    tile_bytes = ty * tx * 4
    need = (bt * (3 * tile_bytes + ty * 128 * 4 + n_pad * 4)
            + 2 * bt * (3 * tx + 3 * ty) * 4
            + (2 << 20))
    vmem_limit = int(min(48 * 1024 * 1024, max(32 * 1024 * 1024, need)))

    kernel = _make_chamfer_kernel(n, n_pad, ty, tx, bt)

    out = pl.pallas_call(
        kernel,
        out_shape=jax.ShapeDtypeStruct((num_bb, bt, 1), jnp.float32),
        grid_spec=pltpu.PrefetchScalarGridSpec(
            num_scalar_prefetch=0,
            grid=(num_bb, n_iy, n_ix),
            in_specs=[
                pl.BlockSpec((bt, 3, tx), lambda b, iy, ix: (b, 0, ix)),
                pl.BlockSpec((bt, ty, 3), lambda b, iy, ix: (b, iy, 0)),
            ],
            out_specs=pl.BlockSpec((1, bt, 1), lambda b, iy, ix: (b, 0, 0)),
            scratch_shapes=[
                pltpu.VMEM((bt, ty, 128), jnp.float32),   # per-lane-column min over x
                pltpu.VMEM((bt, 1, n_pad), jnp.float32),  # running min over y
                pltpu.VMEM((bt, 1, 1), jnp.float32),      # partial y-direction loss
            ],
        ),
        compiler_params=pltpu.CompilerParams(
            dimension_semantics=("parallel", "arbitrary", "arbitrary"),
            vmem_limit_bytes=vmem_limit,
        ),
    )(x_cm, y_pm)

    return jnp.sum(out)   # per-batch partial losses summed in the wrapper


def chamfer_ref(x, y):
    """Pure-JAX reference, mirrors the PyTorch forward exactly."""
    xx = x[:, None, :, :]    # (bs, 1, N, 3)
    yy = y[:, :, None, :]    # (bs, N, 1, 3)
    dist = jnp.sqrt(1e-6 + jnp.sum((xx - yy) ** 2, axis=3))
    min1 = jnp.min(dist, axis=1)
    min2 = jnp.min(dist, axis=2)
    return jnp.sum(min1) + jnp.sum(min2)


if __name__ == "__main__":
    key = jax.random.PRNGKey(0)
    # (2, 256): single tile, num_bb=2 (v7x path); (2, 200): padded/masked path;
    # (4, 128): bt=2 batch blocking; (2, 1024): tiled running-min path.
    for bs, n in [(2, 256), (2, 200), (4, 128), (2, 1024)]:
        kx, ky = jax.random.split(jax.random.fold_in(key, bs * 10000 + n))
        x = jax.random.normal(kx, (bs, n, 3), dtype=jnp.float32)
        y = jax.random.normal(ky, (bs, n, 3), dtype=jnp.float32)

        loss = jax.block_until_ready(chamfer_loss(x, y))
        ref = jax.block_until_ready(chamfer_ref(x, y))

        if not jnp.allclose(loss, ref, rtol=5e-4, atol=1e-2):
            raise AssertionError(f"mismatch at (bs={bs}, n={n}): kernel={loss} ref={ref}")
    print("KERNEL_OK")
</pallas_src>

<mosaic_0001>
module attributes {stable_mosaic.version = 11 : i64} {
  func.func @kernel(%arg0: i32, %arg1: i32, %arg2: i32, %arg3: memref<1x3x256xf32, #tpu.memory_space<vmem>>, %arg4: memref<1x256x3xf32, #tpu.memory_space<vmem>>, %arg5: memref<1x1x1xf32, #tpu.memory_space<vmem>>, %arg6: memref<1x256x128xf32, #tpu.memory_space<vmem>>, %arg7: memref<1x1x256xf32, #tpu.memory_space<vmem>>, %arg8: memref<1x1x1xf32, #tpu.memory_space<vmem>>) attributes {dimension_semantics = [#tpu.dimension_semantics<parallel>, #tpu.dimension_semantics<arbitrary>, #tpu.dimension_semantics<arbitrary>], iteration_bounds = array<i64: 2, 1, 1>, scalar_prefetch = 0 : i64, scratch_operands = 3 : i64, tpu.core_type = #tpu.core_type<tc>, window_params = [{transform_indices = @transform_0, window_bounds = array<i64: 1, 3, 256>}, {transform_indices = @transform_1, window_bounds = array<i64: 1, 256, 3>}, {transform_indices = @transform_2, window_bounds = array<i64: 1, 1, 1>}]} {
    %c256_i32 = arith.constant 256 : i32
    %0 = arith.muli %arg2, %c256_i32 : i32
    %1 = tpu.assume_multiple %0, 256 : i32
    %c0_i32 = arith.constant 0 : i32
    %2 = arith.cmpi eq, %arg1, %c0_i32 : i32
    %c0_i32_0 = arith.constant 0 : i32
    %3 = arith.cmpi eq, %arg2, %c0_i32_0 : i32
    %4 = arith.andi %2, %3 : i1
    %5 = arith.extui %4 : i1 to i32
    %c0_i32_1 = arith.constant 0 : i32
    %6 = arith.cmpi ne, %5, %c0_i32_1 : i32
    scf.if %6 {
      %cst_20 = arith.constant 0.000000e+00 : f32
      %56 = vector.broadcast %cst_20 : f32 to vector<1x1x1xf32>
      %c0_21 = arith.constant 0 : index
      %c0_22 = arith.constant 0 : index
      %c0_23 = arith.constant 0 : index
      %57 = vector.load %arg8[%c0_21, %c0_22, %c0_23] : memref<1x1x1xf32, #tpu.memory_space<vmem>>, vector<1x1x1xf32>
      tpu.vector_store %arg8[%c0_21, %c0_22, %c0_23], %56 {strides = array<i32>} : memref<1x1x1xf32, #tpu.memory_space<vmem>>, vector<1x1x1xf32>,
    } else {
    }
    %c0 = arith.constant 0 : index
    %c0_2 = arith.constant 0 : index
    %c0_3 = arith.constant 0 : index
    %7 = vector.load %arg3[%c0, %c0_2, %c0_3] : memref<1x3x256xf32, #tpu.memory_space<vmem>>, vector<1x3x256xf32>
    %8 = vector.shape_cast %7 : vector<1x3x256xf32> to vector<3x256xf32>
    %c0_4 = arith.constant 0 : index
    %c0_5 = arith.constant 0 : index
    %c0_6 = arith.constant 0 : index
    %9 = vector.load %arg4[%c0_4, %c0_5, %c0_6] : memref<1x256x3xf32, #tpu.memory_space<vmem>>, vector<1x256x3xf32>
    %10 = vector.shape_cast %9 : vector<1x256x3xf32> to vector<256x3xf32>
    %11 = vector.extract_strided_slice %8 {offsets = [0, 0], sizes = [1, 256], strides = [1, 1]} : vector<3x256xf32> to vector<1x256xf32>
    %12 = vector.extract_strided_slice %10 {offsets = [0, 0], sizes = [256, 1], strides = [1, 1]} : vector<256x3xf32> to vector<256x1xf32>
    %13 = vector.broadcast %11 : vector<1x256xf32> to vector<256x256xf32>
    %14 = vector.broadcast %12 : vector<256x1xf32> to vector<256x256xf32>
    %15 = arith.subf %13, %14 : vector<256x256xf32>
    %16 = arith.mulf %15, %15 : vector<256x256xf32>
    %17 = vector.extract_strided_slice %8 {offsets = [1, 0], sizes = [1, 256], strides = [1, 1]} : vector<3x256xf32> to vector<1x256xf32>
    %18 = vector.extract_strided_slice %10 {offsets = [0, 1], sizes = [256, 1], strides = [1, 1]} : vector<256x3xf32> to vector<256x1xf32>
    %19 = vector.broadcast %17 : vector<1x256xf32> to vector<256x256xf32>
    %20 = vector.broadcast %18 : vector<256x1xf32> to vector<256x256xf32>
    %21 = arith.subf %19, %20 : vector<256x256xf32>
    %22 = arith.mulf %21, %21 : vector<256x256xf32>
    %23 = arith.addf %16, %22 : vector<256x256xf32>
    %24 = vector.extract_strided_slice %8 {offsets = [2, 0], sizes = [1, 256], strides = [1, 1]} : vector<3x256xf32> to vector<1x256xf32>
    %25 = vector.extract_strided_slice %10 {offsets = [0, 2], sizes = [256, 1], strides = [1, 1]} : vector<256x3xf32> to vector<256x1xf32>
    %26 = vector.broadcast %24 : vector<1x256xf32> to vector<256x256xf32>
    %27 = vector.broadcast %25 : vector<256x1xf32> to vector<256x256xf32>
    %28 = arith.subf %26, %27 : vector<256x256xf32>
    %29 = arith.mulf %28, %28 : vector<256x256xf32>
    %30 = arith.addf %23, %29 : vector<256x256xf32>
    %31 = vector.extract_strided_slice %30 {offsets = [0, 0], sizes = [256, 128], strides = [1, 1]} : vector<256x256xf32> to vector<256x128xf32>
    %32 = vector.extract_strided_slice %30 {offsets = [0, 128], sizes = [256, 128], strides = [1, 1]} : vector<256x256xf32> to vector<256x128xf32>
    %33 = arith.minimumf %31, %32 : vector<256x128xf32>
    %c0_i32_7 = arith.constant 0 : i32
    %34 = arith.cmpi eq, %arg2, %c0_i32_7 : i32
    %35 = arith.extui %34 : i1 to i32
    %c0_i32_8 = arith.constant 0 : i32
    %36 = arith.cmpi ne, %35, %c0_i32_8 : i32
    scf.if %36 {
      %c0_20 = arith.constant 0 : index
      %c0_21 = arith.constant 0 : index
      %c0_22 = arith.constant 0 : index
      %56 = vector.load %arg6[%c0_20, %c0_21, %c0_22] : memref<1x256x128xf32, #tpu.memory_space<vmem>>, vector<1x256x128xf32>
      %57 = vector.shape_cast %56 : vector<1x256x128xf32> to vector<256x128xf32>
      %58 = vector.shape_cast %33 : vector<256x128xf32> to vector<1x256x128xf32>
      tpu.vector_store %arg6[%c0_20, %c0_21, %c0_22], %58 {strides = array<i32>} : memref<1x256x128xf32, #tpu.memory_space<vmem>>, vector<1x256x128xf32>,
    } else {
    }
    %c0_i32_9 = arith.constant 0 : i32
    %37 = arith.cmpi ne, %arg2, %c0_i32_9 : i32
    %38 = arith.extui %37 : i1 to i32
    %c0_i32_10 = arith.constant 0 : i32
    %39 = arith.cmpi ne, %38, %c0_i32_10 : i32
    scf.if %39 {
      %c0_20 = arith.constant 0 : index
      %c0_21 = arith.constant 0 : index
      %c0_22 = arith.constant 0 : index
      %56 = vector.load %arg6[%c0_20, %c0_21, %c0_22] : memref<1x256x128xf32, #tpu.memory_space<vmem>>, vector<1x256x128xf32>
      %57 = vector.shape_cast %56 : vector<1x256x128xf32> to vector<256x128xf32>
      %58 = arith.minimumf %57, %33 : vector<256x128xf32>
      %c0_23 = arith.constant 0 : index
      %c0_24 = arith.constant 0 : index
      %c0_25 = arith.constant 0 : index
      %59 = vector.load %arg6[%c0_23, %c0_24, %c0_25] : memref<1x256x128xf32, #tpu.memory_space<vmem>>, vector<1x256x128xf32>
      %60 = vector.shape_cast %59 : vector<1x256x128xf32> to vector<256x128xf32>
      %61 = vector.shape_cast %58 : vector<256x128xf32> to vector<1x256x128xf32>
      tpu.vector_store %arg6[%c0_23, %c0_24, %c0_25], %61 {strides = array<i32>} : memref<1x256x128xf32, #tpu.memory_space<vmem>>, vector<1x256x128xf32>,
    } else {
    }
    %cst = arith.constant dense<0x7F800000> : vector<256xf32>
    %40 = vector.multi_reduction <minimumf>, %30, %cst [0] : vector<256x256xf32> to vector<256xf32>
    %41 = vector.shape_cast %40 : vector<256xf32> to vector<1x256xf32>
    %c0_i32_11 = arith.constant 0 : i32
    %42 = arith.cmpi eq, %arg1, %c0_i32_11 : i32
    %43 = arith.extui %42 : i1 to i32
    %c0_i32_12 = arith.constant 0 : i32
    %44 = arith.cmpi ne, %43, %c0_i32_12 : i32
    scf.if %44 {
      %c0_20 = arith.constant 0 : index
      %c0_21 = arith.constant 0 : index
      %56 = arith.index_cast %1 : i32 to index
      %57 = vector.load %arg7[%c0_20, %c0_21, %56] : memref<1x1x256xf32, #tpu.memory_space<vmem>>, vector<1x1x256xf32>
      %58 = vector.shape_cast %57 : vector<1x1x256xf32> to vector<1x256xf32>
      %59 = vector.shape_cast %41 : vector<1x256xf32> to vector<1x1x256xf32>
      tpu.vector_store %arg7[%c0_20, %c0_21, %56], %59 {strides = array<i32>} : memref<1x1x256xf32, #tpu.memory_space<vmem>>, vector<1x1x256xf32>,
    } else {
    }
    %c0_i32_13 = arith.constant 0 : i32
    %45 = arith.cmpi ne, %arg1, %c0_i32_13 : i32
    %46 = arith.extui %45 : i1 to i32
    %c0_i32_14 = arith.constant 0 : i32
    %47 = arith.cmpi ne, %46, %c0_i32_14 : i32
    scf.if %47 {
      %c0_20 = arith.constant 0 : index
      %c0_21 = arith.constant 0 : index
      %56 = arith.index_cast %1 : i32 to index
      %57 = vector.load %arg7[%c0_20, %c0_21, %56] : memref<1x1x256xf32, #tpu.memory_space<vmem>>, vector<1x1x256xf32>
      %58 = vector.shape_cast %57 : vector<1x1x256xf32> to vector<1x256xf32>
      %59 = arith.minimumf %58, %41 : vector<1x256xf32>
      %c0_22 = arith.constant 0 : index
      %c0_23 = arith.constant 0 : index
      %60 = arith.index_cast %1 : i32 to index
      %61 = vector.load %arg7[%c0_22, %c0_23, %60] : memref<1x1x256xf32, #tpu.memory_space<vmem>>, vector<1x1x256xf32>
      %62 = vector.shape_cast %61 : vector<1x1x256xf32> to vector<1x256xf32>
      %63 = vector.shape_cast %59 : vector<1x256xf32> to vector<1x1x256xf32>
      tpu.vector_store %arg7[%c0_22, %c0_23, %60], %63 {strides = array<i32>} : memref<1x1x256xf32, #tpu.memory_space<vmem>>, vector<1x1x256xf32>,
    } else {
    }
    %c0_i32_15 = arith.constant 0 : i32
    %48 = arith.cmpi eq, %arg2, %c0_i32_15 : i32
    %49 = arith.extui %48 : i1 to i32
    %c0_i32_16 = arith.constant 0 : i32
    %50 = arith.cmpi ne, %49, %c0_i32_16 : i32
    scf.if %50 {
      %c0_20 = arith.constant 0 : index
      %c0_21 = arith.constant 0 : index
      %c0_22 = arith.constant 0 : index
      %56 = vector.load %arg6[%c0_20, %c0_21, %c0_22] : memref<1x256x128xf32, #tpu.memory_space<vmem>>, vector<1x256x128xf32>
      %57 = vector.shape_cast %56 : vector<1x256x128xf32> to vector<256x128xf32>
      %cst_23 = arith.constant dense<0x7F800000> : vector<256xf32>
      %58 = vector.multi_reduction <minimumf>, %57, %cst_23 [1] : vector<256x128xf32> to vector<256xf32>
      %59 = vector.shape_cast %58 : vector<256xf32> to vector<256x1xf32>
      %cst_24 = arith.constant 9.99999997E-7 : f32
      %60 = vector.broadcast %cst_24 : f32 to vector<256x1xf32>
      %61 = arith.addf %60, %59 : vector<256x1xf32>
      %62 = math.sqrt %61 : vector<256x1xf32>
      %c0_25 = arith.constant 0 : index
      %c0_26 = arith.constant 0 : index
      %c0_27 = arith.constant 0 : index
      %63 = vector.load %arg8[%c0_25, %c0_26, %c0_27] : memref<1x1x1xf32, #tpu.memory_space<vmem>>, vector<1x1x1xf32>
      %64 = vector.shape_cast %63 : vector<1x1x1xf32> to vector<1x1xf32>
      %65 = vector.shape_cast %62 : vector<256x1xf32> to vector<1x256x1xf32>
      %cst_28 = arith.constant dense<0.000000e+00> : vector<1xf32>
      %66 = vector.multi_reduction <add>, %65, %cst_28 [1, 2] : vector<1x256x1xf32> to vector<1xf32>
      %67 = vector.shape_cast %66 : vector<1xf32> to vector<1x1x1xf32>
      %68 = vector.extract %67[0, 0, 0] : f32 from vector<1x1x1xf32>
      %69 = vector.broadcast %68 : f32 to vector<1x1xf32>
      %70 = arith.addf %64, %69 : vector<1x1xf32>
      %c0_29 = arith.constant 0 : index
      %c0_30 = arith.constant 0 : index
      %c0_31 = arith.constant 0 : index
      %71 = vector.load %arg8[%c0_29, %c0_30, %c0_31] : memref<1x1x1xf32, #tpu.memory_space<vmem>>, vector<1x1x1xf32>
      %72 = vector.shape_cast %71 : vector<1x1x1xf32> to vector<1x1xf32>
      %73 = vector.shape_cast %70 : vector<1x1xf32> to vector<1x1x1xf32>
      tpu.vector_store %arg8[%c0_29, %c0_30, %c0_31], %73 {strides = array<i32>} : memref<1x1x1xf32, #tpu.memory_space<vmem>>, vector<1x1x1xf32>,
    } else {
    }
    %c0_i32_17 = arith.constant 0 : i32
    %51 = arith.cmpi eq, %arg1, %c0_i32_17 : i32
    %c0_i32_18 = arith.constant 0 : i32
    %52 = arith.cmpi eq, %arg2, %c0_i32_18 : i32
    %53 = arith.andi %51, %52 : i1
    %54 = arith.extui %53 : i1 to i32
    %c0_i32_19 = arith.constant 0 : i32
    %55 = arith.cmpi ne, %54, %c0_i32_19 : i32
    scf.if %55 {
      %c0_20 = arith.constant 0 : index
      %c0_21 = arith.constant 0 : index
      %c0_22 = arith.constant 0 : index
      %56 = vector.load %arg7[%c0_20, %c0_21, %c0_22] : memref<1x1x256xf32, #tpu.memory_space<vmem>>, vector<1x1x256xf32>
      %57 = vector.shape_cast %56 : vector<1x1x256xf32> to vector<1x256xf32>
      %cst_23 = arith.constant 9.99999997E-7 : f32
      %58 = vector.broadcast %cst_23 : f32 to vector<1x256xf32>
      %59 = arith.addf %58, %57 : vector<1x256xf32>
      %60 = math.sqrt %59 : vector<1x256xf32>
      %c0_24 = arith.constant 0 : index
      %c0_25 = arith.constant 0 : index
      %c0_26 = arith.constant 0 : index
      %61 = vector.load %arg8[%c0_24, %c0_25, %c0_26] : memref<1x1x1xf32, #tpu.memory_space<vmem>>, vector<1x1x1xf32>
      %62 = vector.shape_cast %61 : vector<1x1x1xf32> to vector<1x1xf32>
      %63 = vector.shape_cast %60 : vector<1x256xf32> to vector<1x1x256xf32>
      %cst_27 = arith.constant dense<0.000000e+00> : vector<1xf32>
      %64 = vector.multi_reduction <add>, %63, %cst_27 [1, 2] : vector<1x1x256xf32> to vector<1xf32>
      %65 = vector.shape_cast %64 : vector<1xf32> to vector<1x1x1xf32>
      %66 = vector.extract %65[0, 0, 0] : f32 from vector<1x1x1xf32>
      %67 = vector.broadcast %66 : f32 to vector<1x1xf32>
      %68 = arith.addf %62, %67 : vector<1x1xf32>
      %c0_28 = arith.constant 0 : index
      %c0_29 = arith.constant 0 : index
      %c0_30 = arith.constant 0 : index
      %69 = vector.load %arg5[%c0_28, %c0_29, %c0_30] : memref<1x1x1xf32, #tpu.memory_space<vmem>>, vector<1x1x1xf32>
      %70 = vector.shape_cast %69 : vector<1x1x1xf32> to vector<1x1xf32>
      %71 = vector.shape_cast %68 : vector<1x1xf32> to vector<1x1x1xf32>
      tpu.vector_store %arg5[%c0_28, %c0_29, %c0_30], %71 {strides = array<i32>} : memref<1x1x1xf32, #tpu.memory_space<vmem>>, vector<1x1x1xf32>,
    } else {
    }
    return
  }
  func.func @transform_0(%arg0: i32, %arg1: i32, %arg2: i32) -> (i32, i32, i32) {
    %c0_i32 = arith.constant 0 : i32
    %c0_i32_0 = arith.constant 0 : i32
    return %arg0, %c0_i32, %arg2 : i32, i32, i32
  }
  func.func @transform_1(%arg0: i32, %arg1: i32, %arg2: i32) -> (i32, i32, i32) {
    %c0_i32 = arith.constant 0 : i32
    %c0_i32_0 = arith.constant 0 : i32
    return %arg0, %arg1, %c0_i32 : i32, i32, i32
  }
  func.func @transform_2(%arg0: i32, %arg1: i32, %arg2: i32) -> (i32, i32, i32) {
    %c0_i32 = arith.constant 0 : i32
    %c0_i32_0 = arith.constant 0 : i32
    %c0_i32_1 = arith.constant 0 : i32
    return %arg0, %c0_i32, %c0_i32_0 : i32, i32, i32
  }
}

</mosaic_0001>

<bundles_post_ra>
// kernel: tpu_custom_call.1
= control target key start
LH: loop header
LB: loop body
LE: loop exit
PB: predicated region body
PF: predicated region fallthrough
CT: control target
= control target key end

     0   :  { %s2288_s9 = smov 0   ;;  %s2290_s10 = smov 0   ;;  %s3360_s0 = inlined_call_operand.vmem [shape: f32[2,3,256], index: 0, kind: input, shape index: {}]   ;;  %s3361_s1 = inlined_call_operand.vmem [shape: f32[2,256,3], index: 1, kind: input, shape index: {}]   ;;  %s3362_s2 = inlined_call_operand.vmem [shape: f32[2,1,1], index: 2, kind: output, shape index: {}]  }
   0x1   :  { %s2292_s11 = smov 0  }
   0x2 LB: > { %s31_s12 = sadd.s32 1, %s2262_s10  ;;  %p2099_p0 = scmp.ge.s32.totalorder %s2266_s11, 1  ;;  %s2266_s11 = sphi %s2292_s11, %s12_s11   ;;  %s2262_s10 = sphi %s2290_s10, %s3438_s10   ;;  %s2258_s9 = sphi %s2288_s9, %s3437_s9  }
   0x3   : > { %p33_p1 = scmp.ge.s32.totalorder %s31_s12, 2  ;;  %p155_p2 = scmp.lt.s32.totalorder %s2266_s11, 3 }
   0x5   : > { %s3440_s12 = smov (%p33_p1, %s31_s12), 0  ;;  %p156_p3 = pnand %p2099_p0, %p155_p2 }
   0x7   : > { %159 = sbr.rel (%p156_p3) target bundleno = 798 (0x31e), region = 28 }
   0xe   : > { %p189_p4 = scmp.lt.s32.totalorder %s2258_s9, 1  ;;  %v3366_v0 = vmov 1   ;;  %v3364_v1 = vmov 0   ;;  %v3371_v22 = vmov 2   ;;  %v3363_v49 = vlaneseq }
   0xf   : > { %2143 = vset.pattern.permute.xlu0 %v3366_v0  ;;  %2141 = vset.pattern.permute.xlu1 %v3364_v1  ;;  %vm1994_vm3 = vcmask 1040384   ;;  %vm1894_vm7 = vcmask 7168  }
  0x10   : > { %s3442_s9 = smov (!%p189_p4, %s2258_s9), 1  ;;  %v2501_v52 = vshrl.u32 %v3363_v49, 7 }
  0x11   : > { %s2107_s13 = sshll.u32 %s3442_s9, 8  ;;  %s2106_s17 = sshll.u32 %s3442_s9, 3 }
  0x12   : > { %s2314_s16 = scalar_lea.vmem %s3361_s1, %s2107_s13  ;;  %3390 = vst [vmem:[#allocation6_spill] sm:$0xff] %v2501_v52  ;;  %s196_s20 = scalar_lea.vmem %s3360_s0, %s2106_s17  ;;  %v2512_v55 = vsub.s32 0, %v2501_v52  ;;  %v260_v56 = vsub.s32 4, %v2501_v52  ;;  %v2516_v57 = vsub.s32 1, %v2501_v52  ;;  %v566_v58 = vsub.s32 5, %v2501_v52 }
  0x13   : > { %v223_v2 = vld [vmem:[%s2314_s16 + $0x10] sm:$0xff]  ;;  %v2318_v3 = vld [vmem:[%s2314_s16 + $0x8] sm:$0xff]  ;;  %v224_v4 = vld [vmem:[%s2314_s16 + $0x18] sm:$0xff]  ;;  %v900_v62 = vsub.s32 2, %v2501_v52  ;;  %v904_v63 = vsub.s32 6, %v2501_v52  ;;  %s210_s25 = scalar_lea.vmem %s3362_s2, %s3442_s9 }
  0x14   : > { %284 = vperm.xlu1 %2141, %v223_v2   ;;  %583 = vperm.xlu0 %2143, %v2318_v3   ;;  %v2323_v5 = vld [vmem:[%s2314_s16 + $0x20] sm:$0xff]  ;;  %v2327_v6 = vld [vmem:[%s2314_s16 + $0x28] sm:$0xff]  ;;  %v2330_v7 = vld [vmem:[%s2314_s16 + $0x38] sm:$0xff]  ;;  %3392 = vst [vmem:[#allocation8_spill] sm:$0xff] %v2512_v55 }
  0x15   : > { %v2335_v8 = vld [vmem:[%s2314_s16 + $0x50] sm:$0xff]  ;;  %v2340_v9 = vld [vmem:[%s2314_s16 + $0x48] sm:$0xff]  ;;  %v2348_v11 = vld [vmem:[%s2314_s16 + $0x58] sm:$0xff]  ;;  %3393 = vst [vmem:[#allocation9_spill] sm:$0xff] %v2516_v57 }
  0x16   : > { %v2343_v10 = vld [vmem:[%s2314_s16 + $0x68] sm:$0xff]  ;;  %v2351_v12 = vld [vmem:[%s2314_s16 + $0x80] sm:$0xff]  ;;  %v2356_v13 = vld [vmem:[%s2314_s16 + $0x98] sm:$0xff] }
  0x17   : > { %v2361_v14 = vld [vmem:[%s2314_s16 + $0x78] sm:$0xff]  ;;  %v2364_v15 = vld [vmem:[%s2314_s16 + $0xb0] sm:$0xff]  ;;  %v2369_v16 = vld [vmem:[%s2314_s16 + $0x88] sm:$0xff] }
  0x18   : > { %289 = vperm.xlu1 %2141, %v224_v4   ;;  %595 = vperm.xlu0 %2143, %v2323_v5   ;;  %v2372_v17 = vld [vmem:[%s2314_s16 + $0xb8] sm:$0xff]  ;;  %v2382_v19 = vld [vmem:[%s2314_s16 + $0xa8] sm:$0xff]  ;;  %v2385_v20 = vld [vmem:[%s2314_s16 + $0xe0] sm:$0xff] }
  0x19   : > { %v2377_v18 = vld [vmem:[%s2314_s16 + $0xd8] sm:$0xff]  ;;  %v221_v21 = vld [vmem:[%s2314_s16] sm:$0xff]  ;;  %v227_v23 = vld [vmem:[%s2314_s16 + $0x30] sm:$0xff] }
  0x1a   : > { %v229_v24 = vld [vmem:[%s2314_s16 + $0x40] sm:$0xff]  ;;  %v235_v26 = vld [vmem:[%s2314_s16 + $0x70] sm:$0xff]  ;;  %v2423_v30 = vld [vmem:[%s2314_s16 + $0xc8] sm:$0xff] }
  0x1b   : > { %v233_v25 = vld [vmem:[%s2314_s16 + $0x60] sm:$0xff]  ;;  %v2406_v27 = vld [vmem:[%s2314_s16 + $0x90] sm:$0xff]  ;;  %v2428_v31 = vld [vmem:[%s2314_s16 + $0xe8] sm:$0xff] }
  0x1c   : > { %299 = vperm.xlu1 %2141, %v2327_v6   ;;  %607 = vperm.xlu0 %2143, %v2330_v7   ;;  %v2412_v28 = vld [vmem:[%s2314_s16 + $0xa0] sm:$0xff]  ;;  %v2432_v32 = vld [vmem:[%s2314_s16 + $0xf0] sm:$0xff] }
  0x1d   : > { %v2418_v29 = vld [vmem:[%s2314_s16 + $0xc0] sm:$0xff] }
  0x1e   : > { %v220_v60 = vld [vmem:[%s196_s20] sm:$0x77] }
  0x20   : > { %309 = vperm.xlu1 %2141, %v2330_v7   ;;  %619 = vperm.xlu0 %2143, %v2335_v8  }
  0x24   : > { %319 = vperm.xlu1 %2141, %v2340_v9   ;;  %631 = vperm.xlu0 %2143, %v2343_v10  }
  0x28   : > { %329 = vperm.xlu1 %2141, %v2348_v11   ;;  %643 = vperm.xlu0 %2143, %v2351_v12  }
  0x2c   : > { %339 = vperm.xlu1 %2141, %v2343_v10   ;;  %655 = vperm.xlu0 %2143, %v2356_v13  }
  0x30   : > { %349 = vperm.xlu1 %2141, %v2361_v14   ;;  %667 = vperm.xlu0 %2143, %v2364_v15  }
  0x34   : > { %359 = vperm.xlu1 %2141, %v2369_v16   ;;  %671 = vperm.xlu0 %2143, %v2372_v17  }
  0x38   : > { %369 = vperm.xlu1 %2141, %v2356_v13   ;;  %687 = vperm.xlu0 %2143, %v2377_v18  }
  0x3c   : > { %379 = vperm.xlu1 %2141, %v2382_v19   ;;  %691 = vperm.xlu0 %2143, %v2385_v20  }
  0x40   : > { %2142 = vset.pattern.permute.xlu1 %v3366_v0  ;;  %2169 = vset.pattern.permute.xlu0 %v3364_v1 }
  0x41   : > { %579 = vperm.xlu1 %2142, %v221_v21   ;;  %274 = vperm.xlu0 %2169, %v221_v21  }
  0x45   : > { %587 = vperm.xlu1 %2142, %v223_v2   ;;  %279 = vperm.xlu0 %2169, %v2318_v3  }
  0x49   : > { %2144 = vset.pattern.permute.xlu1 %v3371_v22  ;;  %294 = vperm.xlu0 %2169, %v2323_v5  }
  0x4a   : > { %917 = vperm.xlu1 %2144, %v221_v21  }
  0x4d   : > { %304 = vperm.xlu0 %2169, %v227_v23  }
  0x4e   : > { %2145 = vset.pattern.permute.xlu1 %v3366_v0 }
  0x4f   : > { %591 = vperm.xlu1 %2145, %v224_v4  }
  0x51   : > { %314 = vperm.xlu0 %2169, %v229_v24  }
  0x53   : > { %2146 = vset.pattern.permute.xlu1 %v3371_v22 }
  0x54   : > { %925 = vperm.xlu1 %2146, %v223_v2   ;;  %v257_v2 = vrot.slane %v220_v60, %v2512_v55 }
  0x55   : > { %324 = vperm.xlu0 %2169, %v2335_v8  }
  0x58   : > { %929 = vperm.xlu1 %2146, %v224_v4   ;;  %v563_v4 = vrot.slane %v220_v60, %v2516_v57 }
  0x59   : > { %334 = vperm.xlu0 %2169, %v233_v25  }
  0x5c   : > { %2147 = vset.pattern.permute.xlu1 %v3366_v0 }
  0x5d   : > { %599 = vperm.xlu1 %2147, %v2327_v6   ;;  %344 = vperm.xlu0 %2169, %v235_v26  }
  0x61   : > { %603 = vperm.xlu1 %2147, %v227_v23   ;;  %354 = vperm.xlu0 %2169, %v2351_v12  }
  0x65   : > { %2148 = vset.pattern.permute.xlu1 %v3371_v22  ;;  %364 = vperm.xlu0 %2169, %v2406_v27  }
  0x66   : > { %937 = vperm.xlu1 %2148, %v2327_v6  }
  0x69   : > { %374 = vperm.xlu0 %2169, %v2412_v28  }
  0x6a   : > { %941 = vperm.xlu1 %2148, %v227_v23  }
  0x6d   : > { %384 = vperm.xlu0 %2169, %v2364_v15  }
  0x6e   : > { %2149 = vset.pattern.permute.xlu1 %v3366_v0 }
  0x6f   : > { %611 = vperm.xlu1 %2149, %v229_v24  }
  0x71   : > { %394 = vperm.xlu0 %2169, %v2418_v29  }
  0x73   : > { %615 = vperm.xlu1 %2149, %v2340_v9  }
  0x75   : > { %399 = vperm.xlu0 %2169, %v2423_v30  }
  0x77   : > { %2150 = vset.pattern.permute.xlu1 %v3371_v22 }
  0x78   : > { %949 = vperm.xlu1 %2150, %v229_v24  }
  0x79   : > { %419 = vperm.xlu0 %2169, %v2428_v31  }
  0x7c   : > { %953 = vperm.xlu1 %2150, %v2340_v9   ;;  %v905_v9 = vrot.slane %v220_v60, %v904_v63 }
  0x7d   : > { %424 = vperm.xlu0 %2169, %v2432_v32  }
  0x80   : > { %2151 = vset.pattern.permute.xlu1 %v3366_v0 }
  0x81   : > { %623 = vperm.xlu1 %2151, %v2348_v11   ;;  %2173 = vset.pattern.permute.xlu0 %v3371_v22 }
  0x82   : > { %921 = vperm.xlu0 %2173, %v2318_v3   ;;  %v261_v3 = vrot.slane %v220_v60, %v260_v56 }
  0x85   : > { %627 = vperm.xlu1 %2151, %v233_v25  }
  0x86   : > { %933 = vperm.xlu0 %2173, %v2323_v5   ;;  %v567_v5 = vrot.slane %v220_v60, %v566_v58 }
  0x89   : > { %2152 = vset.pattern.permute.xlu1 %v3371_v22 }
  0x8a   : > { %961 = vperm.xlu1 %2152, %v2348_v11   ;;  %945 = vperm.xlu0 %2173, %v2330_v7   ;;  %v2534_v11 = vrot.slane %v261_v3, %v2512_v55 }
  0x8e   : > { %965 = vperm.xlu1 %2152, %v233_v25   ;;  %957 = vperm.xlu0 %2173, %v2335_v8   ;;  %v901_v8 = vrot.slane %v220_v60, %v900_v62 }
  0x92   : > { %2153 = vset.pattern.permute.xlu1 %v3366_v0  ;;  %969 = vperm.xlu0 %2173, %v2343_v10   ;;  %v2531_v10 = vrot.slane %v257_v2, %v2512_v55 }
  0x93   : > { %v2447_v33 = vpop.permute.xlu1 %284  ;;  %635 = vperm.xlu1 %2153, %v235_v26   ;;  %v2449_v34 = vpop.permute.xlu0 %583 }
  0x96   : > { %981 = vperm.xlu0 %2173, %v2351_v12   ;;  %v2537_v12 = vrot.slane %v563_v4, %v2516_v57 }
  0x97   : > { %v2452_v35 = vpop.permute.xlu1 %289  ;;  %639 = vperm.xlu1 %2153, %v2361_v14   ;;  %v2455_v36 = vpop.permute.xlu0 %595 }
  0x9a   : > { %993 = vperm.xlu0 %2173, %v2356_v13   ;;  %v2540_v13 = vrot.slane %v567_v5, %v2516_v57 }
  0x9b   : > { %v2458_v37 = vpop.permute.xlu1 %299  ;;  %2154 = vset.pattern.permute.xlu1 %v3371_v22  ;;  %v2461_v38 = vpop.permute.xlu0 %607 }
  0x9c   : > { %973 = vperm.xlu1 %2154, %v235_v26   ;;  %v2549_v26 = vrot.slane %v901_v8, %v900_v62 }
  0x9e   : > { %1013 = vperm.xlu0 %2173, %v2418_v29  }
  0x9f   : > { %v2463_v39 = vpop.permute.xlu1 %309  ;;  %v2466_v40 = vpop.permute.xlu0 %619 }
  0xa0   : > { %977 = vperm.xlu1 %2154, %v2361_v14  }
  0xa2   : > { %1017 = vperm.xlu0 %2173, %v2423_v30  }
  0xa3   : > { %v2469_v41 = vpop.permute.xlu1 %319  ;;  %v2472_v42 = vpop.permute.xlu0 %631 }
  0xa4   : > { %2155 = vset.pattern.permute.xlu1 %v3366_v0 }
  0xa5   : > { %647 = vperm.xlu1 %2155, %v2369_v16  }
  0xa6   : > { %1033 = vperm.xlu0 %2173, %v2428_v31  }
  0xa7   : > { %v2476_v43 = vpop.permute.xlu1 %329  ;;  %v2479_v44 = vpop.permute.xlu0 %643 }
  0xa9   : > { %651 = vperm.xlu1 %2155, %v2406_v27  }
  0xaa   : > { %1037 = vperm.xlu0 %2173, %v2432_v32  }
  0xab   : > { %v2482_v45 = vpop.permute.xlu1 %339  ;;  %v2485_v46 = vpop.permute.xlu0 %655 }
  0xad   : > { %2156 = vset.pattern.permute.xlu1 %v3371_v22 }
  0xae   : > { %985 = vperm.xlu1 %2156, %v2369_v16  }
  0xaf   : > { %v2489_v47 = vpop.permute.xlu1 %349  ;;  %v2491_v48 = vpop.permute.xlu0 %667 }
  0xb2   : > { %989 = vperm.xlu1 %2156, %v2406_v27   ;;  %v2551_v27 = vrot.slane %v905_v9, %v900_v62 }
  0xb3   : > { %v2494_v50 = vpop.permute.xlu1 %359  ;;  %v2496_v51 = vpop.permute.xlu0 %671 }
  0xb4   : > { %3389 = vst [vmem:[#allocation5_spill] sm:$0xff] %v2496_v51 }
  0xb6   : > { %2157 = vset.pattern.permute.xlu1 %v3366_v0 }
  0xb7   : > { %v2503_v53 = vpop.permute.xlu1 %369  ;;  %659 = vperm.xlu1 %2157, %v2412_v28   ;;  %v2506_v54 = vpop.permute.xlu0 %687 }
  0xb8   : > { %3391 = vst [vmem:[#allocation7_spill] sm:$0xff] %v2506_v54 }
  0xbb   : > { %v2519_v59 = vpop.permute.xlu1 %379  ;;  %663 = vperm.xlu1 %2157, %v2382_v19   ;;  %v2522_v61 = vpop.permute.xlu0 %691 }
  0xbc   : > { %3394 = vst [vmem:[#allocation10_spill] sm:$0xff] %v2519_v59  ;;  %3395 = vst [vmem:[#allocation11_spill] sm:$0xff] %v2522_v61  ;;  %v450_v59 = vsub.f32 %v2531_v10, %v2469_v41 }
  0xbf   : > { %2158 = vset.pattern.permute.xlu1 %v3371_v22 }
  0xc0   : > { %997 = vperm.xlu1 %2158, %v2412_v28   ;;  %v580_v6 = vpop.permute.xlu1 %579  ;;  %v275_v7 = vpop.permute.xlu0 %274 }
  0xc1   : > { %v432_v16 = vsub.f32 %v2531_v10, %v275_v7  ;;  %v433_v21 = vsub.f32 %v2534_v11, %v275_v7  ;;  %v706_v23 = vsub.f32 %v2537_v12, %v580_v6  ;;  %v707_v24 = vsub.f32 %v2540_v13, %v580_v6 }
  0xc3   : > { %v496_v28 = vmul.f32 %v432_v16, %v432_v16  ;;  %v497_v56 = vmul.f32 %v433_v21, %v433_v21  ;;  %v771_v58 = vmul.f32 %v707_v24, %v707_v24  ;;  %v436_v24 = vsub.f32 %v2531_v10, %v2447_v33 }
  0xc4   : > { %1001 = vperm.xlu1 %2158, %v2382_v19   ;;  %v588_v14 = vpop.permute.xlu1 %587  ;;  %v2547_v25 = vpop.permute.xlu0 %279  ;;  %v770_v19 = vmul.f32 %v706_v23, %v706_v23 }
  0xc5   : > { %v835_v7 = vadd.f32 %v771_v58, %v497_v56  ;;  %v710_v9 = vsub.f32 %v2537_v12, %v588_v14  ;;  %v711_v16 = vsub.f32 %v2540_v13, %v588_v14  ;;  %v438_v58 = vsub.f32 %v2531_v10, %v2452_v35 }
  0xc6   : > { %v834_v62 = vadd.f32 %v770_v19, %v496_v28 }
  0xc7   : > { %v774_v56 = vmul.f32 %v710_v9, %v710_v9  ;;  %v775_v19 = vmul.f32 %v711_v16, %v711_v16  ;;  %v502_v57 = vmul.f32 %v438_v58, %v438_v58 }
  0xc8   : > { %2159 = vset.pattern.permute.xlu1 %v3364_v1  ;;  %v2554_v60 = vpop.permute.xlu0 %294 }
  0xc9   : > { %389 = vperm.xlu1 %2159, %v2372_v17   ;;  %v918_v63 = vpop.permute.xlu1 %917 }
  0xca   : > { %v1044_v2 = vsub.f32 %v2549_v26, %v918_v63  ;;  %v1045_v3 = vsub.f32 %v2551_v27, %v918_v63  ;;  %v437_v63 = vsub.f32 %v2534_v11, %v2447_v33  ;;  %v439_v33 = vsub.f32 %v2534_v11, %v2452_v35 }
  0xcc   : > { %v1108_v4 = vmul.f32 %v1044_v2, %v1044_v2  ;;  %v1109_v5 = vmul.f32 %v1045_v3, %v1045_v3  ;;  %v2559_v6 = vpop.permute.xlu0 %304  ;;  %v503_v55 = vmul.f32 %v439_v33, %v439_v33 }
  0xcd   : > { %3396 = vst [vmem:[#allocation12_spill] sm:$0xff] %v2559_v6  ;;  %2160 = vset.pattern.permute.xlu1 %v3371_v22 }
  0xce   : > { %1005 = vperm.xlu1 %2160, %v2364_v15   ;;  %v592_v8 = vpop.permute.xlu1 %591  ;;  %v1172_v21 = vadd.f32 %v1108_v4, %v834_v62  ;;  %v1173_v23 = vadd.f32 %v1109_v5, %v835_v7  ;;  %v500_v62 = vmul.f32 %v436_v24, %v436_v24  ;;  %v501_v7 = vmul.f32 %v437_v63, %v437_v63 }
  0xcf   : > { %v712_v28 = vsub.f32 %v2537_v12, %v592_v8  ;;  %v713_v15 = vsub.f32 %v2540_v13, %v592_v8 }
  0xd0   : > { %v2569_v2 = vpop.permute.xlu0 %314  ;;  %v1236_v3 = vmin.f32 %v1172_v21, %v1173_v23  ;;  %v838_v1 = vadd.f32 %v774_v56, %v500_v62 }
  0xd1   : > { %3397 = vst [vmem:[#allocation13_spill] sm:$0xff] %v2569_v2  ;;  %v776_v9 = vmul.f32 %v712_v28, %v712_v28  ;;  %v777_v16 = vmul.f32 %v713_v15, %v713_v15 }
  0xd2   : > { %2161 = vset.pattern.permute.xlu1 %v3366_v0  ;;  %1573 = vmin.xlane.f32.xlu0 %v1236_v3  ;;  %v839_v0 = vadd.f32 %v775_v19, %v501_v7  ;;  %v3398_v19 = vmov 1  }
  0xd3   : > { %675 = vperm.xlu1 %2161, %v2418_v29   ;;  %v926_v14 = vpop.permute.xlu1 %925 }
  0xd4   : > { %v1048_v4 = vsub.f32 %v2549_v26, %v926_v14  ;;  %v1049_v5 = vsub.f32 %v2551_v27, %v926_v14  ;;  %v2581_v8 = vpop.permute.xlu0 %324 }
  0xd6   : > { %v1112_v3 = vmul.f32 %v1048_v4, %v1048_v4  ;;  %v1113_v49 = vmul.f32 %v1049_v5, %v1049_v5  ;;  %v840_v4 = vadd.f32 %v776_v9, %v502_v57  ;;  %v841_v5 = vadd.f32 %v777_v16, %v503_v55 }
  0xd7   : > { %2162 = vset.pattern.permute.xlu1 %v3371_v22  ;;  %v930_v29 = vpop.permute.xlu1 %929 }
  0xd8   : > { %v1050_v35 = vsub.f32 %v2549_v26, %v930_v29  ;;  %v1051_v52 = vsub.f32 %v2551_v27, %v930_v29  ;;  %1009 = vperm.xlu1 %2162, %v2372_v17   ;;  %v2587_v24 = vpop.permute.xlu0 %334  ;;  %v1176_v63 = vadd.f32 %v1112_v3, %v838_v1  ;;  %v1177_v28 = vadd.f32 %v1113_v49, %v839_v0 }
  0xda   : > { %v1114_v15 = vmul.f32 %v1050_v35, %v1050_v35  ;;  %v1115_v14 = vmul.f32 %v1051_v52, %v1051_v52  ;;  %v1238_v22 = vmin.f32 %v1176_v63, %v1177_v28  ;;  %v1403_v56 = vmin.f32 %v1172_v21, %v1176_v63  ;;  %v247_v52 = vld [vmem:[%s2314_s16 + $0xd0] sm:$0xff] }
  0xdb   : > { %v1440_v33 = vmin.f32 %v1173_v23, %v1177_v28  ;;  %v443_v23 = vsub.f32 %v2534_v11, %v2458_v37 }
  0xdc   : > { %2163 = vset.pattern.permute.xlu1 %v3398_v19  ;;  %v600_v58 = vpop.permute.xlu1 %599  ;;  %v1178_v62 = vadd.f32 %v1114_v15, %v840_v4  ;;  %v1179_v7 = vadd.f32 %v1115_v14, %v841_v5  ;;  %1577 = vmin.xlane.f32.xlu0 %v1238_v22  ;;  %v2590_v29 = vpop.permute.xlu0 %344  ;;  %v3400_v22 = vmov 0  }
  0xdd   : > { %679 = vperm.xlu1 %2163, %v2423_v30   ;;  %v716_v55 = vsub.f32 %v2537_v12, %v600_v58  ;;  %v717_v57 = vsub.f32 %v2540_v13, %v600_v58  ;;  %v442_v30 = vsub.f32 %v2531_v10, %v2458_v37  ;;  %v507_v28 = vmul.f32 %v443_v23, %v443_v23 }
  0xde   : > { %v2593_v1 = vmin.f32 %v1403_v56, %v1178_v62  ;;  %v2595_v0 = vmin.f32 %v1440_v33, %v1179_v7  ;;  %v1239_v17 = vmin.f32 %v1178_v62, %v1179_v7  ;;  %v750_v62 = vsub.f32 %v2537_v12, %v2491_v48 }
  0xdf   : > { %v780_v9 = vmul.f32 %v716_v55, %v716_v55  ;;  %v781_v16 = vmul.f32 %v717_v57, %v717_v57  ;;  %v506_v63 = vmul.f32 %v442_v30, %v442_v30  ;;  %v751_v7 = vsub.f32 %v2540_v13, %v2491_v48 }
  0xe0   : > { %v2597_v49 = vpop.permute.xlu1 %603  ;;  %1579 = vmin.xlane.f32.xlu0 %v1239_v17  ;;  %v2602_v21 = vpop.permute.xlu0 %354  ;;  %v720_v57 = vsub.f32 %v2537_v12, %v2461_v38  ;;  %v446_v30 = vsub.f32 %v2531_v10, %v2463_v39  ;;  %v715_v48 = vsub.f32 %v2540_v13, %v2455_v36 }
  0xe1   : > { %3399 = vst [vmem:[#allocation14_spill] sm:$0xff] %v2597_v49  ;;  %2164 = vset.pattern.permute.xlu1 %v3400_v22  ;;  %v844_v58 = vadd.f32 %v780_v9, %v506_v63  ;;  %v845_v33 = vadd.f32 %v781_v16, %v507_v28  ;;  %v815_v63 = vmul.f32 %v751_v7, %v751_v7 }
  0xe2   : > { %404 = vperm.xlu1 %2164, %v247_v52   ;;  %v784_v9 = vmul.f32 %v720_v57, %v720_v57  ;;  %v510_v61 = vmul.f32 %v446_v30, %v446_v30 }
  0xe4   : > { %v2609_v3 = vpop.permute.xlu0 %364 }
  0xe5   : > { %3401 = vst [vmem:[#allocation15_spill] sm:$0xff] %v2609_v3  ;;  %v938_v35 = vpop.permute.xlu1 %937 }
  0xe6   : > { %v1054_v15 = vsub.f32 %v2549_v26, %v938_v35  ;;  %v1055_v14 = vsub.f32 %v2551_v27, %v938_v35  ;;  %2165 = vset.pattern.permute.xlu1 %v3398_v19  ;;  %v814_v35 = vmul.f32 %v750_v62, %v750_v62 }
  0xe7   : > { %683 = vperm.xlu1 %2165, %v247_v52  }
  0xe8   : > { %v1118_v4 = vmul.f32 %v1054_v15, %v1054_v15  ;;  %v1119_v5 = vmul.f32 %v1055_v14, %v1055_v14  ;;  %v2614_v56 = vpop.permute.xlu0 %374 }
  0xe9   : > { %3402 = vst [vmem:[#allocation16_spill] sm:$0xff] %v2614_v56  ;;  %v2616_v37 = vpop.permute.xlu1 %941 }
  0xea   : > { %3403 = vst [vmem:[#allocation17_spill] sm:$0xff] %v2616_v37  ;;  %v2622_v17 = vadd.f32 %v1118_v4, %v844_v58  ;;  %v2624_v55 = vadd.f32 %v1119_v5, %v845_v33  ;;  %v721_v4 = vsub.f32 %v2540_v13, %v2461_v38  ;;  %v447_v5 = vsub.f32 %v2534_v11, %v2463_v39 }
  0xeb   : > { %2166 = vset.pattern.permute.xlu1 %v3400_v22  ;;  %v708_v58 = vsub.f32 %v2537_v12, %v2449_v34  ;;  %v709_v33 = vsub.f32 %v2540_v13, %v2449_v34  ;;  %v726_v38 = vsub.f32 %v2537_v12, %v2466_v40  ;;  %v3405_v39 = vmov 2  }
  0xec   : > { %409 = vperm.xlu1 %2166, %v2377_v18   ;;  %v385_v23 = vpop.permute.xlu0 %384  ;;  %v1241_v16 = vmin.f32 %v2622_v17, %v2624_v55  ;;  %v727_v34 = vsub.f32 %v2540_v13, %v2466_v40  ;;  %v785_v51 = vmul.f32 %v721_v4, %v721_v4  ;;  %v779_v37 = vmul.f32 %v715_v48, %v715_v48 }
  0xed   : > { %v476_v28 = vsub.f32 %v2531_v10, %v385_v23  ;;  %v477_v15 = vsub.f32 %v2534_v11, %v385_v23  ;;  %v714_v23 = vsub.f32 %v2537_v12, %v2455_v36  ;;  %v511_v36 = vmul.f32 %v447_v5, %v447_v5 }
  0xee   : > { %v2640_v14 = vpop.permute.xlu1 %611  ;;  %1583 = vmin.xlane.f32.xlu0 %v1241_v16  ;;  %v772_v57 = vmul.f32 %v708_v58, %v708_v58  ;;  %v790_v30 = vmul.f32 %v726_v38, %v726_v38  ;;  %v791_v49 = vmul.f32 %v727_v34, %v727_v34  ;;  %v451_v40 = vsub.f32 %v2534_v11, %v2469_v41 }
  0xef   : > { %3404 = vst [vmem:[#allocation18_spill] sm:$0xff] %v2640_v14  ;;  %v540_v62 = vmul.f32 %v476_v28, %v476_v28  ;;  %v541_v7 = vmul.f32 %v477_v15, %v477_v15  ;;  %v773_v14 = vmul.f32 %v709_v33, %v709_v33  ;;  %v778_v56 = vmul.f32 %v714_v23, %v714_v23 }
  0xf0   : > { %2167 = vset.pattern.permute.xlu1 %v3405_v39  ;;  %v2657_v16 = vpop.permute.xlu0 %394  ;;  %v733_v48 = vsub.f32 %v2540_v13, %v2472_v42  ;;  %v2683_v5 = vadd.f32 %v785_v51, %v511_v36  ;;  %v454_v41 = vsub.f32 %v2531_v10, %v2476_v43  ;;  %v514_v58 = vmul.f32 %v450_v59, %v450_v59 }
  0xf1   : > { %3406 = vst [vmem:[#allocation19_spill] sm:$0xff] %v2657_v16  ;;  %v2661_v28 = vadd.f32 %v814_v35, %v540_v62  ;;  %v2663_v15 = vadd.f32 %v815_v63, %v541_v7  ;;  %1021 = vperm.xlu1 %2167, %v247_v52   ;;  %v2672_v52 = vadd.f32 %v784_v9, %v510_v61 }
  0xf2   : > { %v616_v54 = vpop.permute.xlu1 %615  ;;  %v732_v35 = vsub.f32 %v2537_v12, %v2472_v42  ;;  %v458_v63 = vsub.f32 %v2531_v10, %v2482_v45  ;;  %v455_v61 = vsub.f32 %v2534_v11, %v2476_v43  ;;  %v459_v9 = vsub.f32 %v2534_v11, %v2482_v45 }
  0xf3   : > { %3407 = vst [vmem:[#allocation20_spill] sm:$0xff] %v2661_v28  ;;  %3408 = vst [vmem:[#allocation21_spill] sm:$0xff] %v2663_v15  ;;  %v434_v42 = vsub.f32 %v2531_v10, %v2547_v25  ;;  %v738_v33 = vsub.f32 %v2537_v12, %v2479_v44  ;;  %v435_v51 = vsub.f32 %v2534_v11, %v2547_v25 }
  0xf4   : > { %v2667_v16 = vpop.permute.xlu0 %399  ;;  %v440_v62 = vsub.f32 %v2531_v10, %v2554_v60  ;;  %v2701_v23 = vmul.f32 %v451_v40, %v451_v40  ;;  %v441_v43 = vsub.f32 %v2534_v11, %v2554_v60  ;;  %v452_v45 = vsub.f32 %v2531_v10, %v2581_v8 }
  0xf5   : > { %3409 = vst [vmem:[#allocation22_spill] sm:$0xff] %v2667_v16  ;;  %2168 = vset.pattern.permute.xlu1 %v3400_v22  ;;  %v453_v59 = vsub.f32 %v2534_v11, %v2581_v8  ;;  %v796_v38 = vmul.f32 %v732_v35, %v732_v35  ;;  %v797_v34 = vmul.f32 %v733_v48, %v733_v48 }
  0xf6   : > { %414 = vperm.xlu1 %2168, %v2385_v20   ;;  %v739_v25 = vsub.f32 %v2540_v13, %v2479_v44  ;;  %v522_v36 = vmul.f32 %v458_v63, %v458_v63  ;;  %v2712_v40 = vmul.f32 %v454_v41, %v454_v41  ;;  %v2714_v16 = vmul.f32 %v455_v61, %v455_v61 }
  0xf7   : > { %v2681_v4 = vpop.permute.xlu1 %949  ;;  %v523_v60 = vmul.f32 %v459_v9, %v459_v9  ;;  %v498_v15 = vmul.f32 %v434_v42, %v434_v42  ;;  %v2717_v28 = vmul.f32 %v738_v33, %v738_v33  ;;  %v499_v8 = vmul.f32 %v435_v51, %v435_v51 }
  0xf8   : > { %3410 = vst [vmem:[#allocation23_spill] sm:$0xff] %v2681_v4  ;;  %v2699_v7 = vpop.permute.xlu0 %419  ;;  %v504_v35 = vmul.f32 %v440_v62, %v440_v62  ;;  %v724_v48 = vsub.f32 %v2537_v12, %v616_v54  ;;  %v505_v44 = vmul.f32 %v441_v43, %v441_v43  ;;  %v516_v63 = vmul.f32 %v452_v45, %v452_v45 }
  0xf9   : > { %3411 = vst [vmem:[#allocation24_spill] sm:$0xff] %v2699_v7  ;;  %v517_v2 = vmul.f32 %v453_v59, %v453_v59  ;;  %v725_v41 = vsub.f32 %v2540_v13, %v616_v54  ;;  %v2723_v3 = vmul.f32 %v739_v25, %v739_v25  ;;  %v456_v61 = vsub.f32 %v2531_v10, %v2587_v24 }
  0xfa   : > { %2170 = vset.pattern.permute.xlu1 %v3405_v39  ;;  %v2729_v9 = vadd.f32 %v796_v38, %v522_v36  ;;  %v836_v42 = vadd.f32 %v772_v57, %v498_v15  ;;  %v460_v33 = vsub.f32 %v2531_v10, %v2590_v29  ;;  %v464_v51 = vsub.f32 %v2531_v10, %v2602_v21 }
  0xfb   : > { %v954_v7 = vpop.permute.xlu1 %953  ;;  %1025 = vperm.xlu1 %2170, %v2377_v18   ;;  %v457_v18 = vsub.f32 %v2534_v11, %v2587_v24  ;;  %v2736_v62 = vadd.f32 %v797_v34, %v523_v60  ;;  %v837_v43 = vadd.f32 %v773_v14, %v499_v8  ;;  %v842_v45 = vadd.f32 %v778_v56, %v504_v35 }
  0xfc   : > { %v2720_v4 = vpop.permute.xlu0 %424  ;;  %v465_v59 = vsub.f32 %v2534_v11, %v2602_v21  ;;  %v788_v24 = vmul.f32 %v724_v48, %v724_v48  ;;  %v843_v15 = vadd.f32 %v779_v37, %v505_v44  ;;  %v2741_v57 = vadd.f32 %v790_v30, %v516_v63 }
  0xfd   : > { %3412 = vst [vmem:[#allocation25_spill] sm:$0xff] %v2720_v4  ;;  %v2743_v38 = vadd.f32 %v791_v49, %v517_v2  ;;  %v789_v25 = vmul.f32 %v725_v41, %v725_v41  ;;  %v520_v4 = vmul.f32 %v456_v61, %v456_v61  ;;  %v521_v6 = vmul.f32 %v457_v18, %v457_v18 }
  0xfe   : > { %v2749_v56 = vsub.f32 %v2534_v11, %v2590_v29  ;;  %v2751_v21 = vmul.f32 %v460_v33, %v460_v33  ;;  %v1062_v37 = vsub.f32 %v2549_v26, %v954_v7  ;;  %v2756_v49 = vmul.f32 %v465_v59, %v465_v59 }
  0xff   : > { %2171 = vset.pattern.permute.xlu1 %v3398_v19  ;;  %v852_v8 = vadd.f32 %v788_v24, %v514_v58  ;;  %v1063_v35 = vsub.f32 %v2551_v27, %v954_v7  ;;  %v853_v63 = vadd.f32 %v789_v25, %v2701_v23  ;;  %v3413_v24 = vmin.f32 %v2622_v17, %v2593_v1 }
 0x100   : > { %v624_v54 = vpop.permute.xlu1 %623  ;;  %695 = vperm.xlu1 %2171, %v2428_v31   ;;  %v2753_v31 = vmul.f32 %v464_v51, %v464_v51  ;;  %v1126_v58 = vmul.f32 %v1062_v37, %v1062_v37  ;;  %v3414_v23 = vmin.f32 %v2624_v55, %v2595_v0 }
 0x101   : > { %v922_v36 = vpop.permute.xlu0 %921  ;;  %v728_v7 = vsub.f32 %v2537_v12, %v624_v54 }
 0x102   : > { %v1046_v34 = vsub.f32 %v2549_v26, %v922_v36  ;;  %v1047_v14 = vsub.f32 %v2551_v27, %v922_v36 }
 0x104   : > { %v628_v2 = vpop.permute.xlu1 %627  ;;  %v1110_v30 = vmul.f32 %v1046_v34, %v1046_v34  ;;  %v1111_v60 = vmul.f32 %v1047_v14, %v1047_v14  ;;  %2172 = vset.pattern.permute.xlu1 %v3405_v39  ;;  %v729_v34 = vsub.f32 %v2540_v13, %v624_v54  ;;  %v792_v54 = vmul.f32 %v728_v7, %v728_v7 }
 0x105   : > { %v730_v48 = vsub.f32 %v2537_v12, %v628_v2  ;;  %v731_v29 = vsub.f32 %v2540_v13, %v628_v2  ;;  %v934_v44 = vpop.permute.xlu0 %933  ;;  %1029 = vperm.xlu1 %2172, %v2385_v20  }
 0x106   : > { %v2764_v41 = vadd.f32 %v1110_v30, %v836_v42  ;;  %v2766_v61 = vadd.f32 %v1111_v60, %v837_v43  ;;  %v1052_v18 = vsub.f32 %v2549_v26, %v934_v44  ;;  %v1053_v33 = vsub.f32 %v2551_v27, %v934_v44 }
 0x107   : > { %v794_v51 = vmul.f32 %v730_v48, %v730_v48  ;;  %v795_v59 = vmul.f32 %v731_v29, %v731_v29  ;;  %v1127_v60 = vmul.f32 %v1063_v35, %v1063_v35 }
 0x108   : > { %v2775_v20 = vmin.f32 %v2764_v41, %v3413_v24  ;;  %v2781_v42 = vmin.f32 %v2766_v61, %v3414_v23  ;;  %v1116_v43 = vmul.f32 %v1052_v18, %v1052_v18  ;;  %v1117_v25 = vmul.f32 %v1053_v33, %v1053_v33  ;;  %v252_v18 = vld [vmem:[%s2314_s16 + $0xf8] sm:$0xff] }
 0x109   : > { %v962_v36 = vpop.permute.xlu1 %961  ;;  %v858_v14 = vadd.f32 %v794_v51, %v520_v4  ;;  %v859_v37 = vadd.f32 %v795_v59, %v521_v6  ;;  %v946_v2 = vpop.permute.xlu0 %945  ;;  %2174 = vset.pattern.permute.xlu1 %v3398_v19  ;;  %v2794_v4 = vadd.f32 %v1126_v58, %v852_v8  ;;  %v793_v33 = vmul.f32 %v729_v34, %v729_v34 }
 0x10a   : > { %v1066_v1 = vsub.f32 %v2549_v26, %v962_v36  ;;  %v2786_v17 = vadd.f32 %v1116_v43, %v842_v45  ;;  %v2788_v30 = vadd.f32 %v1117_v25, %v843_v15  ;;  %v1058_v0 = vsub.f32 %v2549_v26, %v946_v2  ;;  %699 = vperm.xlu1 %2174, %v2432_v32  }
 0x10b   : > { %v1059_v55 = vsub.f32 %v2551_v27, %v946_v2  ;;  %v1067_v6 = vsub.f32 %v2551_v27, %v962_v36  ;;  %v2809_v2 = vadd.f32 %v1127_v60, %v853_v63 }
 0x10c   : > { %v1408_v48 = vmin.f32 %v2775_v20, %v2786_v17  ;;  %v1445_v45 = vmin.f32 %v2781_v42, %v2788_v30  ;;  %v1122_v15 = vmul.f32 %v1058_v0, %v1058_v0  ;;  %v1130_v51 = vmul.f32 %v1066_v1, %v1066_v1 }
 0x10d   : > { %v1123_v29 = vmul.f32 %v1059_v55, %v1059_v55  ;;  %v966_v44 = vpop.permute.xlu1 %965  ;;  %v958_v59 = vpop.permute.xlu0 %957  ;;  %v856_v20 = vadd.f32 %v792_v54, %v2712_v40  ;;  %v1131_v23 = vmul.f32 %v1067_v6, %v1067_v6  ;;  %v857_v1 = vadd.f32 %v793_v33, %v2714_v16 }
 0x10e   : > { %v1068_v32 = vsub.f32 %v2549_v26, %v966_v44  ;;  %v1069_v35 = vsub.f32 %v2551_v27, %v966_v44  ;;  %v1064_v8 = vsub.f32 %v2549_v26, %v958_v59  ;;  %v1065_v58 = vsub.f32 %v2551_v27, %v958_v59  ;;  %2175 = vset.pattern.permute.xlu1 %v3400_v22 }
 0x10f   : > { %v1186_v7 = vadd.f32 %v1122_v15, %v2672_v52  ;;  %v1187_v24 = vadd.f32 %v1123_v29, %v2683_v5  ;;  %429 = vperm.xlu1 %2175, %v252_v18   ;;  %v2816_v5 = vadd.f32 %v1130_v51, %v856_v20  ;;  %v1245_v29 = vmin.f32 %v2794_v4, %v2809_v2 }
 0x110   : > { %v1132_v42 = vmul.f32 %v1068_v32, %v1068_v32  ;;  %v1133_v43 = vmul.f32 %v1069_v35, %v1069_v35  ;;  %v1128_v25 = vmul.f32 %v1064_v8, %v1064_v8  ;;  %v1129_v36 = vmul.f32 %v1065_v58, %v1065_v58 }
 0x111   : > { %v1243_v34 = vmin.f32 %v1186_v7, %v1187_v24  ;;  %v970_v52 = vpop.permute.xlu0 %969  ;;  %v866_v44 = vadd.f32 %v2717_v28, %v2753_v31 }
 0x112   : > { %v2812_v0 = vadd.f32 %v1132_v42, %v858_v14  ;;  %v2814_v22 = vadd.f32 %v1133_v43, %v859_v37  ;;  %v636_v55 = vpop.permute.xlu1 %635  ;;  %v2819_v40 = vadd.f32 %v1128_v25, %v2741_v57  ;;  %v2822_v54 = vadd.f32 %v1129_v36, %v2743_v38 }
 0x113   : > { %v1070_v6 = vsub.f32 %v2549_v26, %v970_v52  ;;  %v1071_v63 = vsub.f32 %v2551_v27, %v970_v52  ;;  %1587 = vmin.xlane.f32.xlu0 %v1243_v34  ;;  %v734_v16 = vsub.f32 %v2537_v12, %v636_v55  ;;  %v735_v14 = vsub.f32 %v2540_v13, %v636_v55 }
 0x114   : > { %2176 = vset.pattern.permute.xlu1 %v3398_v19  ;;  %v2829_v37 = vadd.f32 %v1131_v23, %v857_v1  ;;  %v1248_v57 = vmin.f32 %v2812_v0, %v2814_v22  ;;  %v525_v38 = vmul.f32 %v2749_v56, %v2749_v56  ;;  %v1410_v60 = vmin.f32 %v1408_v48, %v2819_v40 }
 0x115   : > { %v1447_v15 = vmin.f32 %v1445_v45, %v2822_v54  ;;  %703 = vperm.xlu1 %2176, %v252_v18   ;;  %v867_v19 = vadd.f32 %v2723_v3, %v2756_v49  ;;  %v1134_v33 = vmul.f32 %v1070_v6, %v1070_v6  ;;  %v1135_v51 = vmul.f32 %v1071_v63, %v1071_v63  ;;  %v982_v59 = vpop.permute.xlu0 %981 }
 0x116   : > { %v640_v32 = vpop.permute.xlu1 %639  ;;  %v1412_v56 = vmin.f32 %v1410_v60, %v2812_v0  ;;  %v1076_v45 = vsub.f32 %v2549_v26, %v982_v59  ;;  %v1077_v35 = vsub.f32 %v2551_v27, %v982_v59  ;;  %v798_v8 = vmul.f32 %v734_v16, %v734_v16 }
 0x117   : > { %v1449_v48 = vmin.f32 %v1447_v15, %v2814_v22  ;;  %1591 = vmin.xlane.f32.xlu0 %v1245_v29  ;;  %v799_v58 = vmul.f32 %v735_v14, %v735_v14  ;;  %v736_v28 = vsub.f32 %v2537_v12, %v640_v32  ;;  %v1247_v3 = vmin.f32 %v2816_v5, %v2829_v37  ;;  %v3427_v22 = vld [vmem:[#allocation19_spill] sm:$0xff] }
 0x118   : > { %v1414_v31 = vmin.f32 %v1412_v56, %v1186_v7  ;;  %v1140_v20 = vmul.f32 %v1076_v45, %v1076_v45  ;;  %v1141_v23 = vmul.f32 %v1077_v35, %v1077_v35  ;;  %v737_v42 = vsub.f32 %v2540_v13, %v640_v32 }
 0x119   : > { %v1451_v49 = vmin.f32 %v1449_v48, %v1187_v24  ;;  %2177 = vset.pattern.permute.xlu1 %v3405_v39  ;;  %v1198_v43 = vadd.f32 %v1134_v33, %v2729_v9  ;;  %v1199_v25 = vadd.f32 %v1135_v51, %v2736_v62  ;;  %v462_v36 = vsub.f32 %v2531_v10, %v2489_v47 }
 0x11a   : > { %1041 = vperm.xlu1 %2177, %v252_v18   ;;  %v463_v34 = vsub.f32 %v2534_v11, %v2489_v47  ;;  %v2858_v1 = vadd.f32 %v1140_v20, %v866_v44  ;;  %v2860_v7 = vadd.f32 %v1141_v23, %v867_v19  ;;  %v862_v39 = vadd.f32 %v798_v8, %v2751_v21 }
 0x11b   : > { %1595 = vmin.xlane.f32.xlu0 %v1247_v3  ;;  %v974_v24 = vpop.permute.xlu1 %973  ;;  %v863_v52 = vadd.f32 %v799_v58, %v525_v38  ;;  %v800_v6 = vmul.f32 %v736_v28, %v736_v28  ;;  %v801_v63 = vmul.f32 %v737_v42, %v737_v42  ;;  %v1249_v14 = vmin.f32 %v1198_v43, %v1199_v25 }
 0x11c   : > { %v1072_v18 = vsub.f32 %v2549_v26, %v974_v24  ;;  %v1073_v9 = vsub.f32 %v2551_v27, %v974_v24  ;;  %v1416_v62 = vmin.f32 %v1414_v31, %v2858_v1  ;;  %v1453_v55 = vmin.f32 %v1451_v49, %v2860_v7 }
 0x11d   : > { %v526_v60 = vmul.f32 %v462_v36, %v462_v36  ;;  %v527_v15 = vmul.f32 %v463_v34, %v463_v34  ;;  %v745_v35 = vsub.f32 %v2540_v13, %v2485_v46  ;;  %v470_v28 = vsub.f32 %v2531_v10, %v2503_v53 }
 0x11e   : > { %v1136_v47 = vmul.f32 %v1072_v18, %v1072_v18  ;;  %v1137_v16 = vmul.f32 %v1073_v9, %v1073_v9  ;;  %v1418_v29 = vmin.f32 %v1416_v62, %v2794_v4  ;;  %v1455_v21 = vmin.f32 %v1453_v55, %v2809_v2  ;;  %v3415_v62 = vld [vmem:[#allocation12_spill] sm:$0xff] }
 0x11f   : > { %v978_v44 = vpop.permute.xlu1 %977  ;;  %1599 = vmin.xlane.f32.xlu0 %v1249_v14  ;;  %v864_v56 = vadd.f32 %v800_v6, %v526_v60  ;;  %v865_v48 = vadd.f32 %v801_v63, %v527_v15  ;;  %v744_v2 = vsub.f32 %v2537_v12, %v2485_v46  ;;  %v466_v23 = vsub.f32 %v2531_v10, %v2494_v50 }
 0x120   : > { %v2869_v19 = vadd.f32 %v1136_v47, %v862_v39  ;;  %v2871_v33 = vadd.f32 %v1137_v16, %v863_v52  ;;  %v1074_v38 = vsub.f32 %v2549_v26, %v978_v44  ;;  %v1075_v51 = vsub.f32 %v2551_v27, %v978_v44  ;;  %v994_v52 = vpop.permute.xlu0 %993 }
 0x121   : > { %v1420_v59 = vmin.f32 %v1418_v29, %v2816_v5  ;;  %v1457_v32 = vmin.f32 %v1455_v21, %v2829_v37  ;;  %v471_v5 = vsub.f32 %v2534_v11, %v2503_v53  ;;  %v467_v46 = vsub.f32 %v2534_v11, %v2494_v50 }
 0x122   : > { %v1138_v45 = vmul.f32 %v1074_v38, %v1074_v38  ;;  %v1139_v4 = vmul.f32 %v1075_v51, %v1075_v51  ;;  %v808_v36 = vmul.f32 %v744_v2, %v744_v2  ;;  %v809_v53 = vmul.f32 %v745_v35, %v745_v35  ;;  %v3416_v51 = vld [vmem:[#allocation15_spill] sm:$0xff] }
 0x123   : > { %v1422_v8 = vmin.f32 %v1420_v59, %v2869_v19  ;;  %v1459_v58 = vmin.f32 %v1457_v32, %v2871_v33  ;;  %v534_v18 = vmul.f32 %v470_v28, %v470_v28  ;;  %v535_v9 = vmul.f32 %v471_v5, %v471_v5 }
 0x124   : > { %v648_v37 = vpop.permute.xlu1 %647  ;;  %v1202_v3 = vadd.f32 %v1138_v45, %v864_v56  ;;  %v1203_v31 = vadd.f32 %v1139_v4, %v865_v48  ;;  %v444_v55 = vsub.f32 %v2531_v10, %v3415_v62  ;;  %v530_v50 = vmul.f32 %v466_v23, %v466_v23  ;;  %v3417_v48 = vld [vmem:[#allocation13_spill] sm:$0xff]  ;;  %v3418_v4 = vld [vmem:[#allocation14_spill] sm:$0xff] }
 0x125   : > { %v1407_v49 = vmin.f32 %v1198_v43, %v1422_v8  ;;  %v1444_v20 = vmin.f32 %v1199_v25, %v1459_v58  ;;  %v740_v34 = vsub.f32 %v2537_v12, %v648_v37  ;;  %v741_v43 = vsub.f32 %v2540_v13, %v648_v37 }
 0x126   : > { %v1251_v42 = vmin.f32 %v1202_v3, %v1203_v31  ;;  %v531_v6 = vmul.f32 %v467_v46, %v467_v46  ;;  %v1082_v63 = vsub.f32 %v2549_v26, %v994_v52  ;;  %v1083_v47 = vsub.f32 %v2551_v27, %v994_v52 }
 0x127   : > { %v2892_v24 = vmin.f32 %v1407_v49, %v1202_v3  ;;  %v2894_v39 = vmin.f32 %v1444_v20, %v1203_v31  ;;  %v804_v16 = vmul.f32 %v740_v34, %v740_v34  ;;  %v805_v60 = vmul.f32 %v741_v43, %v741_v43 }
 0x128   : > { %v652_v25 = vpop.permute.xlu1 %651  ;;  %1603 = vmin.xlane.f32.xlu0 %v1251_v42  ;;  %v872_v29 = vadd.f32 %v808_v36, %v534_v18  ;;  %v873_v21 = vadd.f32 %v809_v53, %v535_v9  ;;  %v445_v44 = vsub.f32 %v2534_v11, %v3415_v62  ;;  %v508_v38 = vmul.f32 %v444_v55, %v444_v55 }
 0x129   : > { %v742_v14 = vsub.f32 %v2537_v12, %v652_v25  ;;  %v743_v15 = vsub.f32 %v2540_v13, %v652_v25  ;;  %v468_v59 = vsub.f32 %v2531_v10, %v3416_v51  ;;  %v469_v32 = vsub.f32 %v2534_v11, %v3416_v51 }
 0x12a   : > { %v448_v45 = vsub.f32 %v2531_v10, %v3417_v48  ;;  %v718_v2 = vsub.f32 %v2537_v12, %v3418_v4  ;;  %v1146_v58 = vmul.f32 %v1082_v63, %v1082_v63  ;;  %v1147_v28 = vmul.f32 %v1083_v47, %v1083_v47 }
 0x12b   : > { %v868_v5 = vadd.f32 %v804_v16, %v530_v50  ;;  %v806_v37 = vmul.f32 %v742_v14, %v742_v14  ;;  %v869_v3 = vadd.f32 %v805_v60, %v531_v6  ;;  %v807_v31 = vmul.f32 %v743_v15, %v743_v15  ;;  %v3419_v60 = vld [vmem:[#allocation10_spill] sm:$0xff] }
 0x12c   : > { %v449_v23 = vsub.f32 %v2534_v11, %v3417_v48  ;;  %v719_v46 = vsub.f32 %v2540_v13, %v3418_v4  ;;  %v532_v42 = vmul.f32 %v468_v59, %v468_v59  ;;  %v533_v36 = vmul.f32 %v469_v32, %v469_v32  ;;  %v3420_v48 = vld [vmem:[#allocation17_spill] sm:$0xff] }
 0x12d   : > { %v986_v56 = vpop.permute.xlu1 %985  ;;  %v782_v43 = vmul.f32 %v718_v2, %v718_v2  ;;  %v2921_v62 = vadd.f32 %v1146_v58, %v872_v29  ;;  %v2923_v55 = vadd.f32 %v1147_v28, %v873_v21  ;;  %v509_v16 = vmul.f32 %v445_v44, %v445_v44 }
 0x12e   : > { %v1078_v35 = vsub.f32 %v2549_v26, %v986_v56  ;;  %v1079_v8 = vsub.f32 %v2551_v27, %v986_v56  ;;  %v870_v25 = vadd.f32 %v806_v37, %v532_v42  ;;  %v871_v50 = vadd.f32 %v807_v31, %v533_v36  ;;  %v3422_v37 = vld [vmem:[#allocation18_spill] sm:$0xff]  ;;  %v3423_v42 = vld [vmem:[#allocation23_spill] sm:$0xff] }
 0x12f   : > { %v783_v14 = vmul.f32 %v719_v46, %v719_v46  ;;  %v474_v15 = vsub.f32 %v2531_v10, %v3419_v60  ;;  %v475_v51 = vsub.f32 %v2534_v11, %v3419_v60  ;;  %v512_v21 = vmul.f32 %v448_v45, %v448_v45 }
 0x130   : > { %v1142_v49 = vmul.f32 %v1078_v35, %v1078_v35  ;;  %v1143_v20 = vmul.f32 %v1079_v8, %v1079_v8  ;;  %v513_v56 = vmul.f32 %v449_v23, %v449_v23  ;;  %v1056_v4 = vsub.f32 %v2549_v26, %v3420_v48 }
 0x131   : > { %v990_v34 = vpop.permute.xlu1 %989  ;;  %v1057_v44 = vsub.f32 %v2551_v27, %v3420_v48  ;;  %v846_v2 = vadd.f32 %v782_v43, %v508_v38  ;;  %v1255_v58 = vmin.f32 %v2921_v62, %v2923_v55  ;;  %v847_v28 = vadd.f32 %v783_v14, %v509_v16 }
 0x132   : > { %v1080_v53 = vsub.f32 %v2549_v26, %v990_v34  ;;  %v1081_v18 = vsub.f32 %v2551_v27, %v990_v34  ;;  %v1206_v9 = vadd.f32 %v1142_v49, %v868_v5  ;;  %v1207_v52 = vadd.f32 %v1143_v20, %v869_v3  ;;  %v3421_v5 = vld [vmem:[#allocation16_spill] sm:$0xff] }
 0x133   : > { %v472_v45 = vsub.f32 %v2531_v10, %v3421_v5  ;;  %v722_v3 = vsub.f32 %v2537_v12, %v3422_v37  ;;  %v723_v31 = vsub.f32 %v2540_v13, %v3422_v37  ;;  %v1120_v23 = vmul.f32 %v1056_v4, %v1056_v4 }
 0x134   : > { %v1144_v6 = vmul.f32 %v1080_v53, %v1080_v53  ;;  %v1145_v63 = vmul.f32 %v1081_v18, %v1081_v18  ;;  %v1253_v47 = vmin.f32 %v1206_v9, %v1207_v52  ;;  %v1121_v46 = vmul.f32 %v1057_v44, %v1057_v44 }
 0x135   : > { %v1060_v36 = vsub.f32 %v2549_v26, %v3423_v42  ;;  %v1061_v34 = vsub.f32 %v2551_v27, %v3423_v42  ;;  %v473_v53 = vsub.f32 %v2534_v11, %v3421_v5 }
 0x136   : > { %v2929_v59 = vadd.f32 %v1144_v6, %v870_v25  ;;  %v2931_v32 = vadd.f32 %v1145_v63, %v871_v50  ;;  %v660_v29 = vpop.permute.xlu1 %659  ;;  %1607 = vmin.xlane.f32.xlu0 %v1253_v47  ;;  %v787_v25 = vmul.f32 %v723_v31, %v723_v31  ;;  %v538_v63 = vmul.f32 %v474_v15, %v474_v15 }
 0x137   : > { %v746_v38 = vsub.f32 %v2537_v12, %v660_v29  ;;  %v536_v47 = vmul.f32 %v472_v45, %v472_v45  ;;  %v1124_v60 = vmul.f32 %v1060_v36, %v1060_v36  ;;  %v1185_v4 = vadd.f32 %v1121_v46, %v847_v28 }
 0x138   : > { %v1411_v35 = vmin.f32 %v2892_v24, %v2929_v59  ;;  %v1448_v8 = vmin.f32 %v2894_v39, %v2931_v32  ;;  %v747_v24 = vsub.f32 %v2540_v13, %v660_v29  ;;  %v1125_v29 = vmul.f32 %v1061_v34, %v1061_v34 }
 0x139   : > { %v810_v16 = vmul.f32 %v746_v38, %v746_v38  ;;  %v539_v31 = vmul.f32 %v475_v51, %v475_v51 }
 0x13a   : > { %v1413_v49 = vmin.f32 %v1411_v35, %v1206_v9  ;;  %v1450_v20 = vmin.f32 %v1448_v8, %v1207_v52  ;;  %v664_v39 = vpop.permute.xlu1 %663  ;;  %1611 = vmin.xlane.f32.xlu0 %v1255_v58  ;;  %v1237_v9 = vmin.f32 %v2764_v41, %v2766_v61  ;;  %v786_v52 = vmul.f32 %v722_v3, %v722_v3 }
 0x13b   : > { %v748_v50 = vsub.f32 %v2537_v12, %v664_v39  ;;  %v749_v6 = vsub.f32 %v2540_v13, %v664_v39  ;;  %v811_v14 = vmul.f32 %v747_v24, %v747_v24  ;;  %v1240_v61 = vmin.f32 %v2786_v17, %v2788_v30 }
 0x13c   : > { %v1415_v18 = vmin.f32 %v1413_v49, %v2921_v62  ;;  %v1452_v43 = vmin.f32 %v1450_v20, %v2923_v55  ;;  %v1184_v62 = vadd.f32 %v1120_v23, %v846_v2  ;;  %v537_v55 = vmul.f32 %v473_v53, %v473_v53 }
 0x13d   : > { %v850_v35 = vadd.f32 %v786_v52, %v512_v21  ;;  %v851_v8 = vadd.f32 %v787_v25, %v513_v56  ;;  %v812_v15 = vmul.f32 %v748_v50, %v748_v50  ;;  %v813_v58 = vmul.f32 %v749_v6, %v749_v6 }
 0x13e   : > { %1575 = vmin.xlane.f32.xlu1 %v1237_v9  ;;  %v874_v5 = vadd.f32 %v810_v16, %v536_v47  ;;  %v875_v45 = vadd.f32 %v811_v14, %v537_v55  ;;  %v1242_v28 = vmin.f32 %v1184_v62, %v1185_v4  ;;  %v1246_v50 = vmin.f32 %v2819_v40, %v2822_v54  ;;  %v3425_v40 = vld [vmem:[#allocation21_spill] sm:$0xff] }
 0x13f   : > { %v998_v48 = vpop.permute.xlu1 %997  ;;  %v1188_v38 = vadd.f32 %v1124_v60, %v850_v35  ;;  %v1189_v24 = vadd.f32 %v1125_v29, %v851_v8  ;;  %v876_v21 = vadd.f32 %v812_v15, %v538_v63  ;;  %v877_v56 = vadd.f32 %v813_v58, %v539_v31 }
 0x140   : > { %v1084_v44 = vsub.f32 %v2549_v26, %v998_v48  ;;  %v1085_v41 = vsub.f32 %v2551_v27, %v998_v48  ;;  %v1250_v58 = vmin.f32 %v2869_v19, %v2871_v33 }
 0x141   : > { %v1244_v53 = vmin.f32 %v1188_v38, %v1189_v24 }
 0x142   : > { %v1148_v37 = vmul.f32 %v1084_v44, %v1084_v44  ;;  %v1149_v3 = vmul.f32 %v1085_v41, %v1085_v41  ;;  %1581 = vmin.xlane.f32.xlu1 %v1240_v61  ;;  %v3424_v44 = vld [vmem:[#allocation20_spill] sm:$0xff] }
 0x143   : > { %v1002_v2 = vpop.permute.xlu1 %1001 }
 0x144   : > { %v2967_v49 = vadd.f32 %v1148_v37, %v874_v5  ;;  %v2969_v20 = vadd.f32 %v1149_v3, %v875_v45  ;;  %v1086_v17 = vsub.f32 %v2549_v26, %v1002_v2  ;;  %v1087_v30 = vsub.f32 %v2551_v27, %v1002_v2  ;;  %v1014_v37 = vpop.permute.xlu0 %1013 }
 0x145   : > { %v481_v2 = vsub.f32 %v2534_v11, %v3427_v22 }
 0x146   : > { %v1417_v39 = vmin.f32 %v1415_v18, %v2967_v49  ;;  %v1454_v23 = vmin.f32 %v1452_v43, %v2969_v20  ;;  %v1150_v46 = vmul.f32 %v1086_v17, %v1086_v17  ;;  %v1151_v51 = vmul.f32 %v1087_v30, %v1087_v30  ;;  %1585 = vmin.xlane.f32.xlu1 %v1242_v28 }
 0x148   : > { %v1214_v42 = vadd.f32 %v1150_v46, %v876_v21  ;;  %v1215_v36 = vadd.f32 %v1151_v51, %v877_v56  ;;  %v390_v34 = vpop.permute.xlu1 %389  ;;  %v3428_v21 = vld [vmem:[#allocation22_spill] sm:$0xff] }
 0x149   : > { %v478_v60 = vsub.f32 %v2531_v10, %v390_v34  ;;  %v479_v29 = vsub.f32 %v2534_v11, %v390_v34  ;;  %v482_v56 = vsub.f32 %v2531_v10, %v3428_v21  ;;  %v1254_v34 = vmin.f32 %v2929_v59, %v2931_v32 }
 0x14a   : > { %v1419_v9 = vmin.f32 %v1417_v39, %v1214_v42  ;;  %v1456_v52 = vmin.f32 %v1454_v23, %v1215_v36  ;;  %1589 = vmin.xlane.f32.xlu1 %v1244_v53  ;;  %v1257_v25 = vmin.f32 %v1214_v42, %v1215_v36  ;;  %v483_v39 = vsub.f32 %v2534_v11, %v3428_v21 }
 0x14b   : > { %v542_v5 = vmul.f32 %v478_v60, %v478_v60  ;;  %v543_v45 = vmul.f32 %v479_v29, %v479_v29  ;;  %v1093_v36 = vsub.f32 %v2551_v27, %v1014_v37 }
 0x14c   : > { %1615 = vmin.xlane.f32.xlu0 %v1257_v25  ;;  %v1421_v63 = vmin.f32 %v1419_v9, %v1184_v62  ;;  %v1458_v18 = vmin.f32 %v1456_v52, %v1185_v4  ;;  %v3426_v4 = vld [vmem:[#allocation5_spill] sm:$0xff]  ;;  %v1018_v52 = vpop.permute.xlu0 %1017 }
 0x14d   : > { %v1006_v6 = vpop.permute.xlu1 %1005  ;;  %v752_v61 = vsub.f32 %v2537_v12, %v3426_v4  ;;  %v753_v35 = vsub.f32 %v2540_v13, %v3426_v4  ;;  %v1157_v29 = vmul.f32 %v1093_v36, %v1093_v36 }
 0x14e   : > { %v1088_v43 = vsub.f32 %v2549_v26, %v1006_v6  ;;  %v1089_v47 = vsub.f32 %v2551_v27, %v1006_v6  ;;  %1593 = vmin.xlane.f32.xlu1 %v1246_v50  ;;  %v1423_v48 = vmin.f32 %v1421_v63, %v1188_v38  ;;  %v1460_v55 = vmin.f32 %v1458_v18, %v1189_v24 }
 0x14f   : > { %v816_v3 = vmul.f32 %v752_v61, %v752_v61  ;;  %v817_v31 = vmul.f32 %v753_v35, %v753_v35  ;;  %v1252_v38 = vmin.f32 %v2858_v1, %v2860_v7  ;;  %v545_v1 = vmul.f32 %v481_v2, %v481_v2 }
 0x150   : > { %v1152_v16 = vmul.f32 %v1088_v43, %v1088_v43  ;;  %v1153_v14 = vmul.f32 %v1089_v47, %v1089_v47  ;;  %v1092_v7 = vsub.f32 %v2549_v26, %v1014_v37  ;;  %v546_v6 = vmul.f32 %v482_v56, %v482_v56 }
 0x151   : > { %v880_v23 = vadd.f32 %v816_v3, %v542_v5  ;;  %v881_v46 = vadd.f32 %v817_v31, %v543_v45  ;;  %v547_v63 = vmul.f32 %v483_v39, %v483_v39  ;;  %v1094_v18 = vsub.f32 %v2549_v26, %v1018_v52 }
 0x152   : > { %v2982_v41 = vadd.f32 %v1152_v16, %v3424_v44  ;;  %v2985_v54 = vadd.f32 %v1153_v14, %v3425_v40  ;;  %1597 = vmin.xlane.f32.xlu1 %v1248_v57  ;;  %v676_v62 = vpop.permute.xlu1 %675  ;;  %v480_v57 = vsub.f32 %v2531_v10, %v3427_v22  ;;  %v1095_v43 = vsub.f32 %v2551_v27, %v1018_v52 }
 0x153   : > { %v754_v19 = vsub.f32 %v2537_v12, %v676_v62  ;;  %v755_v33 = vsub.f32 %v2540_v13, %v676_v62  ;;  %v1156_v32 = vmul.f32 %v1092_v7, %v1092_v7  ;;  %v1158_v62 = vmul.f32 %v1094_v18, %v1094_v18 }
 0x154   : > { %v2995_v8 = vmin.f32 %v2982_v41, %v1423_v48  ;;  %v2998_v15 = vmin.f32 %v2985_v54, %v1460_v55  ;;  %v1258_v0 = vmin.f32 %v2982_v41, %v2985_v54  ;;  %v544_v30 = vmul.f32 %v480_v57, %v480_v57 }
 0x155   : > { %v818_v53 = vmul.f32 %v754_v19, %v754_v19  ;;  %v819_v9 = vmul.f32 %v755_v33, %v755_v33  ;;  %v1256_v55 = vmin.f32 %v2967_v49, %v2969_v20  ;;  %v1159_v4 = vmul.f32 %v1095_v43, %v1095_v43 }
 0x156   : > { %1601 = vmin.xlane.f32.xlu1 %v1250_v58 }
 0x157   : > { %v1010_v28 = vpop.permute.xlu1 %1009  ;;  %v882_v44 = vadd.f32 %v818_v53, %v544_v30  ;;  %v883_v41 = vadd.f32 %v819_v9, %v545_v1  ;;  %v3429_v9 = vld [vmem:[#allocation7_spill] sm:$0xff] }
 0x158   : > { %v1090_v24 = vsub.f32 %v2549_v26, %v1010_v28  ;;  %v1091_v17 = vsub.f32 %v2551_v27, %v1010_v28  ;;  %v760_v52 = vsub.f32 %v2537_v12, %v3429_v9 }
 0x159   : > { %v1220_v22 = vadd.f32 %v1156_v32, %v882_v44  ;;  %v1221_v57 = vadd.f32 %v1157_v29, %v883_v41  ;;  %v3431_v44 = vld [vmem:[#allocation24_spill] sm:$0xff] }
 0x15a   : > { %v1154_v51 = vmul.f32 %v1090_v24, %v1090_v24  ;;  %v1155_v42 = vmul.f32 %v1091_v17, %v1091_v17  ;;  %1605 = vmin.xlane.f32.xlu1 %v1252_v38  ;;  %v824_v43 = vmul.f32 %v760_v52, %v760_v52  ;;  %v490_v41 = vsub.f32 %v2531_v10, %v3431_v44 }
 0x15b   : > { %v1260_v31 = vmin.f32 %v1220_v22, %v1221_v57 }
 0x15c   : > { %v1218_v25 = vadd.f32 %v1154_v51, %v880_v23  ;;  %v1219_v50 = vadd.f32 %v1155_v42, %v881_v46  ;;  %v680_v47 = vpop.permute.xlu1 %679 }
 0x15d   : > { %v756_v60 = vsub.f32 %v2537_v12, %v680_v47  ;;  %v757_v59 = vsub.f32 %v2540_v13, %v680_v47 }
 0x15e   : > { %v1426_v16 = vmin.f32 %v2995_v8, %v1218_v25  ;;  %v1463_v14 = vmin.f32 %v2998_v15, %v1219_v50  ;;  %1609 = vmin.xlane.f32.xlu1 %v1254_v34  ;;  %v1259_v48 = vmin.f32 %v1218_v25, %v1219_v50  ;;  %v761_v25 = vsub.f32 %v2540_v13, %v3429_v9  ;;  %v3432_v9 = vld [vmem:[#allocation25_spill] sm:$0xff] }
 0x15f   : > { %v820_v40 = vmul.f32 %v756_v60, %v756_v60  ;;  %v821_v54 = vmul.f32 %v757_v59, %v757_v59  ;;  %v3430_v60 = vld [vmem:[#allocation11_spill] sm:$0xff]  ;;  %v492_v52 = vsub.f32 %v2531_v10, %v3432_v9 }
 0x160   : > { %1619 = vmin.xlane.f32.xlu0 %v1259_v48  ;;  %v825_v47 = vmul.f32 %v761_v25, %v761_v25  ;;  %v762_v59 = vsub.f32 %v2537_v12, %v3430_v60  ;;  %v493_v25 = vsub.f32 %v2534_v11, %v3432_v9  ;;  %v3433_v9 = vld [vmem:[#allocation6_spill] sm:$0xff] }
 0x161   : > { %v884_v61 = vadd.f32 %v820_v40, %v546_v6  ;;  %v885_v35 = vadd.f32 %v821_v54, %v547_v63  ;;  %v405_v8 = vpop.permute.xlu1 %404  ;;  %v491_v40 = vsub.f32 %v2534_v11, %v3431_v44 }
 0x162   : > { %1613 = vmin.xlane.f32.xlu1 %v1256_v55  ;;  %v484_v19 = vsub.f32 %v2531_v10, %v405_v8  ;;  %v485_v33 = vsub.f32 %v2534_v11, %v405_v8 }
 0x163   : > { %v1222_v15 = vadd.f32 %v1158_v62, %v884_v61  ;;  %v1223_v58 = vadd.f32 %v1159_v4, %v885_v35  ;;  %v1034_v4 = vpop.permute.xlu0 %1033 }
 0x164   : > { %v548_v30 = vmul.f32 %v484_v19, %v484_v19  ;;  %v549_v21 = vmul.f32 %v485_v33, %v485_v33 }
 0x165   : > { %v1425_v5 = vmin.f32 %v1222_v15, %v1426_v16  ;;  %v1462_v45 = vmin.f32 %v1223_v58, %v1463_v14  ;;  %v1261_v49 = vmin.f32 %v1222_v15, %v1223_v58 }
 0x166   : > { %1617 = vmin.xlane.f32.xlu1 %v1258_v0  ;;  %v684_v37 = vpop.permute.xlu1 %683 }
 0x167   : > { %v1427_v20 = vmin.f32 %v1425_v5, %v1220_v22  ;;  %v1464_v3 = vmin.f32 %v1462_v45, %v1221_v57  ;;  %1623 = vmin.xlane.f32.xlu0 %v1261_v49  ;;  %v758_v28 = vsub.f32 %v2537_v12, %v684_v37  ;;  %v759_v38 = vsub.f32 %v2540_v13, %v684_v37 }
 0x168   : > { %v1102_v22 = vsub.f32 %v2549_v26, %v1034_v4  ;;  %v1103_v57 = vsub.f32 %v2551_v27, %v1034_v4  ;;  %v763_v37 = vsub.f32 %v2540_v13, %v3430_v60 }
 0x169   : > { %v822_v24 = vmul.f32 %v758_v28, %v758_v28  ;;  %v823_v0 = vmul.f32 %v759_v38, %v759_v38  ;;  %v554_v28 = vmul.f32 %v490_v41, %v490_v41 }
 0x16a   : > { %1621 = vmin.xlane.f32.xlu1 %v1260_v31 }
 0x16b   : > { %v410_v2 = vpop.permute.xlu1 %409  ;;  %v886_v23 = vadd.f32 %v822_v24, %v548_v30  ;;  %v887_v46 = vadd.f32 %v823_v0, %v549_v21  ;;  %v1166_v24 = vmul.f32 %v1102_v22, %v1102_v22  ;;  %v1167_v0 = vmul.f32 %v1103_v57, %v1103_v57 }
 0x16c   : > { %v486_v1 = vsub.f32 %v2531_v10, %v410_v2  ;;  %v487_v7 = vsub.f32 %v2534_v11, %v410_v2 }
 0x16e   : > { %v550_v50 = vmul.f32 %v486_v1, %v486_v1  ;;  %v551_v6 = vmul.f32 %v487_v7, %v487_v7  ;;  %v1038_v1 = vpop.permute.xlu0 %1037 }
 0x170   : > { %v1022_v17 = vpop.permute.xlu1 %1021  ;;  %v888_v32 = vadd.f32 %v824_v43, %v550_v50  ;;  %v889_v29 = vadd.f32 %v825_v47, %v551_v6  ;;  %v1104_v43 = vsub.f32 %v2549_v26, %v1038_v1  ;;  %v1105_v47 = vsub.f32 %v2551_v27, %v1038_v1 }
 0x171   : > { %v1096_v56 = vsub.f32 %v2549_v26, %v1022_v17  ;;  %v1097_v39 = vsub.f32 %v2551_v27, %v1022_v17 }
 0x173   : > { %v1160_v51 = vmul.f32 %v1096_v56, %v1096_v56  ;;  %v1161_v42 = vmul.f32 %v1097_v39, %v1097_v39  ;;  %v826_v56 = vmul.f32 %v762_v59, %v762_v59  ;;  %v827_v39 = vmul.f32 %v763_v37, %v763_v37 }
 0x175   : > { %v415_v36 = vpop.permute.xlu1 %414  ;;  %v1224_v34 = vadd.f32 %v1160_v51, %v886_v23  ;;  %v1225_v53 = vadd.f32 %v1161_v42, %v887_v46 }
 0x176   : > { %v488_v54 = vsub.f32 %v2531_v10, %v415_v36  ;;  %v489_v62 = vsub.f32 %v2534_v11, %v415_v36 }
 0x177   : > { %v1262_v63 = vmin.f32 %v1224_v34, %v1225_v53  ;;  %v1428_v61 = vmin.f32 %v1224_v34, %v1427_v20  ;;  %v1465_v35 = vmin.f32 %v1225_v53, %v1464_v3  ;;  %v555_v20 = vmul.f32 %v491_v40, %v491_v40 }
 0x178   : > { %v552_v19 = vmul.f32 %v488_v54, %v488_v54  ;;  %v553_v33 = vmul.f32 %v489_v62, %v489_v62  ;;  %v1168_v54 = vmul.f32 %v1104_v43, %v1104_v43  ;;  %v1169_v62 = vmul.f32 %v1105_v47, %v1105_v47  ;;  %v1574_v47 = vpop.xlane.xlu0 %1573 }
 0x179   : > { %1625 = vmin.xlane.f32.xlu1 %v1262_v63 }
 0x17a   : > { %v1026_v18 = vpop.permute.xlu1 %1025  ;;  %v890_v7 = vadd.f32 %v826_v56, %v552_v19  ;;  %v891_v36 = vadd.f32 %v827_v39, %v553_v33 }
 0x17b   : > { %v1098_v16 = vsub.f32 %v2549_v26, %v1026_v18  ;;  %v1099_v14 = vsub.f32 %v2551_v27, %v1026_v18 }
 0x17d   : > { %v1162_v48 = vmul.f32 %v1098_v16, %v1098_v16  ;;  %v1163_v55 = vmul.f32 %v1099_v14, %v1099_v14 }
 0x17f   : > { %v1226_v8 = vadd.f32 %v1162_v48, %v888_v32  ;;  %v1227_v15 = vadd.f32 %v1163_v55, %v889_v29  ;;  %v696_v58 = vpop.permute.xlu1 %695  ;;  %v556_v29 = vmul.f32 %v492_v52, %v492_v52  ;;  %v557_v48 = vmul.f32 %v493_v25, %v493_v25 }
 0x180   : > { %v764_v5 = vsub.f32 %v2537_v12, %v696_v58  ;;  %v765_v45 = vsub.f32 %v2540_v13, %v696_v58 }
 0x181   : > { %v1429_v49 = vmin.f32 %v1226_v8, %v1428_v61  ;;  %v1466_v31 = vmin.f32 %v1227_v15, %v1465_v35  ;;  %v1263_v2 = vmin.f32 %v1226_v8, %v1227_v15 }
 0x182   : > { %v828_v3 = vmul.f32 %v764_v5, %v764_v5  ;;  %v829_v38 = vmul.f32 %v765_v45, %v765_v45 }
 0x183   : > { %1627 = vmin.xlane.f32.xlu0 %v1263_v2 }
 0x184   : > { %v892_v17 = vadd.f32 %v828_v3, %v554_v28  ;;  %v893_v30 = vadd.f32 %v829_v38, %v555_v20  ;;  %v1030_v21 = vpop.permute.xlu1 %1029 }
 0x185   : > { %v1100_v23 = vsub.f32 %v2549_v26, %v1030_v21  ;;  %v1101_v46 = vsub.f32 %v2551_v27, %v1030_v21 }
 0x186   : > { %v1230_v51 = vadd.f32 %v1166_v24, %v892_v17  ;;  %v1231_v42 = vadd.f32 %v1167_v0, %v893_v30 }
 0x187   : > { %v1164_v34 = vmul.f32 %v1100_v23, %v1100_v23  ;;  %v1165_v53 = vmul.f32 %v1101_v46, %v1101_v46  ;;  %v2271_v23 = vmov 1966171168  }
 0x188   : > { %v1265_v50 = vmin.f32 %v1230_v51, %v1231_v42  ;;  %v1484_v46 = vunpack.c.l.s4 %v2271_v23 }
 0x189   : > { %v1228_v6 = vadd.f32 %v1164_v34, %v890_v7  ;;  %v1229_v63 = vadd.f32 %v1165_v53, %v891_v36  ;;  %v700_v18 = vpop.permute.xlu1 %699 }
 0x18a   : > { %v766_v16 = vsub.f32 %v2537_v12, %v700_v18  ;;  %v767_v14 = vsub.f32 %v2540_v13, %v700_v18  ;;  %1631 = vmin.xlane.f32.xlu0 %v1265_v50  ;;  %v1485_v7 = vunpack.c.0.s8 %v1484_v46  ;;  %v3434_v18 = vlaneseq }
 0x18b   : > { %v1430_v60 = vmin.f32 %v1228_v6, %v1429_v49  ;;  %v1467_v59 = vmin.f32 %v1229_v63, %v1466_v31  ;;  %v1264_v32 = vmin.f32 %v1228_v6, %v1229_v63 }
 0x18c   : > { %v830_v55 = vmul.f32 %v766_v16, %v766_v16  ;;  %v831_v44 = vmul.f32 %v767_v14, %v767_v14  ;;  %v1488_v52 = vsub.s32 %v1485_v7, %v3433_v9  ;;  %vm1503_vm0 = vcmp.lt.s32.totalorder %v3434_v18, 256  ;;  %v1578_v16 = vpop.xlane.xlu0 %1577 }
 0x18d   : > { %v1431_v41 = vmin.f32 %v1230_v51, %v1430_v60  ;;  %v1468_v40 = vmin.f32 %v1231_v42, %v1467_v59  ;;  %1629 = vmin.xlane.f32.xlu1 %v1264_v32  ;;  %v1637_v59 = vadd.f32 1e-06, %v1574_v47  ;;  %v1639_v32 = vadd.f32 1e-06, %v1578_v16 }
 0x18e   : > { %v894_v4 = vadd.f32 %v830_v55, %v556_v29  ;;  %v895_v61 = vadd.f32 %v831_v44, %v557_v48  ;;  %v430_v35 = vpop.permute.xlu1 %429 }
 0x18f   : > { %v494_v49 = vsub.f32 %v2531_v10, %v430_v35  ;;  %v495_v31 = vsub.f32 %v2534_v11, %v430_v35  ;;  %vm1671_vm4 = vcmp.eq.f32.partialorder %v1637_v59, inf  ;;  %vm1685_vm5 = vcmp.eq.f32.partialorder %v1639_v32, inf }
 0x190   : > { %v1232_v8 = vadd.f32 %v1168_v54, %v894_v4  ;;  %v1233_v15 = vadd.f32 %v1169_v62, %v895_v61  ;;  %v1580_v29 = vpop.xlane.xlu0 %1579  ;;  %vm1673_vm6 = vcmp.eq.f32.partialorder %v1637_v59, 0.0  ;;  %vm1687_vm8 = vcmp.eq.f32.partialorder %v1639_v32, 0.0 }
 0x191   : > { %v558_v3 = vmul.f32 %v494_v49, %v494_v49  ;;  %v559_v38 = vmul.f32 %v495_v31, %v495_v31  ;;  %v3076_v48 = vadd.f32 1e-06, %v1580_v29 }
 0x192   : > { %v1432_v58 = vmin.f32 %v1232_v8, %v1431_v41  ;;  %v1469_v22 = vmin.f32 %v1233_v15, %v1468_v40  ;;  %v1266_v57 = vmin.f32 %v1232_v8, %v1233_v15 }
 0x193   : > { %vm1692_vm9 = vcmp.eq.f32.partialorder %v3076_v48, inf  ;;  %vm1694_vm10 = vcmp.eq.f32.partialorder %v3076_v48, 0.0  ;;  %v1695_v7 = vand.u32 2147483648, %v3076_v48 }
 0x194   : > { %v704_v5 = vpop.permute.xlu1 %703  ;;  %1633 = vmin.xlane.f32.xlu1 %v1266_v57  ;;  %v1584_v55 = vpop.xlane.xlu0 %1583 }
 0x195   : > { %v768_v45 = vsub.f32 %v2537_v12, %v704_v5  ;;  %v769_v37 = vsub.f32 %v2540_v13, %v704_v5  ;;  %v3079_v41 = vadd.f32 1e-06, %v1584_v55  ;;  %v3436_v5 = vld [vmem:[#allocation9_spill] sm:$0xff] }
 0x197   : > { %v832_v2 = vmul.f32 %v768_v45, %v768_v45  ;;  %v833_v28 = vmul.f32 %v769_v37, %v769_v37  ;;  %vm1706_vm13 = vcmp.eq.f32.partialorder %v3079_v41, inf  ;;  %v1709_v29 = vand.u32 2147483648, %v3079_v41 }
 0x199   : > { %v1042_v20 = vpop.permute.xlu1 %1041  ;;  %v896_v24 = vadd.f32 %v832_v2, %v558_v3  ;;  %v897_v0 = vadd.f32 %v833_v28, %v559_v38 }
 0x19a   : > { %v1106_v19 = vsub.f32 %v2549_v26, %v1042_v20  ;;  %v1107_v33 = vsub.f32 %v2551_v27, %v1042_v20 }
 0x19c   : > { %v1170_v17 = vmul.f32 %v1106_v19, %v1106_v19  ;;  %v1171_v12 = vmul.f32 %v1107_v33, %v1107_v33 }
 0x19e   : > { %v1234_v30 = vadd.f32 %v1170_v17, %v896_v24  ;;  %v1235_v13 = vadd.f32 %v1171_v12, %v897_v0  ;;  %v1674_v12 = vand.u32 2147483648, %v1637_v59 }
 0x1a0   : > { %v1433_v21 = vmin.f32 %v1234_v30, %v1432_v58  ;;  %v1470_v56 = vmin.f32 %v1235_v13, %v1469_v22  ;;  %v1267_v10 = vmin.f32 %v1234_v30, %v1235_v13  ;;  %v1588_v54 = vpop.xlane.xlu0 %1587  ;;  %v3435_v22 = vld [vmem:[#allocation8_spill] sm:$0xff] }
 0x1a1   : > { %v3084_v58 = vadd.f32 1e-06, %v1588_v54 }
 0x1a2   : > { %v1434_v39 = vrot.slane %v1433_v21, 4  ;;  %v1471_v11 = vrot.slane %v1470_v56, 4  ;;  %1635 = vmin.xlane.f32.xlu0 %v1267_v10  ;;  %v1688_v10 = vand.u32 2147483648, %v1639_v32 }
 0x1a4   : > { %v1435_v51 = vmin.f32 %v1433_v21, %v1434_v39  ;;  %v1472_v42 = vmin.f32 %v1470_v56, %v1471_v11  ;;  %v1592_v33 = vpop.xlane.xlu0 %1591 }
 0x1a5   : > { %v3096_v21 = vadd.f32 1e-06, %v1592_v33 }
 0x1a6   : > { %v1436_v1 = vrot.slane %v1435_v51, 2  ;;  %v1473_v26 = vrot.slane %v1472_v42, 2 }
 0x1a8   : > { %v1437_v27 = vmin.f32 %v1435_v51, %v1436_v1  ;;  %v1474_v36 = vmin.f32 %v1472_v42, %v1473_v26 }
 0x1aa   : > { %v1438_v34 = vrot.slane %v1437_v27, 1  ;;  %v1475_v53 = vrot.slane %v1474_v36, 1 }
 0x1ac   : > { %v1439_v25 = vmin.f32 %v1437_v27, %v1438_v34  ;;  %v1476_v50 = vmin.f32 %v1474_v36, %v1475_v53  ;;  %v1596_v27 = vpop.xlane.xlu0 %1595 }
 0x1ad   : > { %v3121_v47 = vadd.f32 1e-06, %v1596_v27 }
 0x1ae   : > { %v1482_v6 = vcombine.low %v1439_v25, %v1476_v50 }
 0x1b0   : > { %v1489_v63 = vrot.slane %v1482_v6, %v1488_v52 }
 0x1b2   : > { %v1496_v43 = vrot.slane %v1489_v63, %v1488_v52 }
 0x1b4   : > { %1505 = vst.msk [vmem:[#allocation3] sm:$0x3] %vm1503_vm0, %v1496_v43  ;;  %vm1708_vm0 = vcmp.eq.f32.partialorder %v3079_v41, 0.0 }
 0x1bb   : > { %v1973_v14 = vld [vmem:[#allocation3] sm:$0x3] }
 0x1bc   : > { %v1974_v60 = vadd.f32 1e-06, %v1973_v14 }
 0x1be   : > { %2178 = vrsqrt.f32 %v1974_v60  ;;  %vm1977_vm1 = vcmp.eq.f32.partialorder %v1974_v60, inf  ;;  %v1980_v62 = vand.u32 2147483648, %v1974_v60  ;;  %vm1979_vm2 = vcmp.eq.f32.partialorder %v1974_v60, 0.0 }
 0x1bf   : > { %2180 = vrsqrt.f32 %v1637_v59 }
 0x1c0   : > { %2182 = vrsqrt.f32 %v1639_v32 }
 0x1c1   : > { %2184 = vrsqrt.f32 %v3076_v48 }
 0x1c2   : > { %2186 = vrsqrt.f32 %v3079_v41 }
 0x1c8   : > { %v2179_v44 = vpop.eup %2178 }
 0x1c9   : > { %v1976_v40 = vmul.f32 %v2179_v44, %v1974_v60  ;;  %v2181_v15 = vpop.eup %2180 }
 0x1ca   : > { %v2183_v37 = vpop.eup %2182  ;;  %v1670_v28 = vmul.f32 %v2181_v15, %v1637_v59 }
 0x1cb   : > { %v1576_v4 = vpop.xlane.xlu1 %1575  ;;  %v1978_v61 = vsel %vm1977_vm1, %v1974_v60, %v1976_v40  ;;  %v1684_v38 = vmul.f32 %v2183_v37, %v1639_v32  ;;  %v2185_v19 = vpop.eup %2184  ;;  %vm1720_vm1 = vcmp.eq.f32.partialorder %v3084_v58, inf }
 0x1cc   : > { %v3082_v35 = vadd.f32 1e-06, %v1576_v4  ;;  %v1981_v8 = vsel %vm1979_vm2, %v1980_v62, %v1978_v61  ;;  %v1672_v0 = vsel %vm1671_vm4, %v1637_v59, %v1670_v28  ;;  %v1691_v13 = vmul.f32 %v2185_v19, %v3076_v48  ;;  %v2187_v56 = vpop.eup %2186 }
 0x1cd   : > { %v1987_v57 = vrot.slane %v1981_v8, %v3435_v22  ;;  %v1991_v45 = vrot.slane %v1981_v8, %v3436_v5  ;;  %v1686_v30 = vsel %vm1685_vm5, %v1639_v32, %v1684_v38  ;;  %v1675_v39 = vsel %vm1673_vm6, %v1674_v12, %v1672_v0 }
 0x1ce   : > { %2188 = vrsqrt.f32 %v3082_v35  ;;  %v1689_v46 = vsel %vm1687_vm8, %v1688_v10, %v1686_v30  ;;  %v1693_v42 = vsel %vm1692_vm9, %v3076_v48, %v1691_v13  ;;  %v1705_v1 = vmul.f32 %v2187_v56, %v3079_v41 }
 0x1cf   : > { %v1582_v49 = vpop.xlane.xlu1 %1581  ;;  %v1995_v31 = vsel %vm1994_vm3, %v1987_v57, 0.0  ;;  %v1996_v2 = vsel %vm1994_vm3, %v1991_v45, 0.0  ;;  %2190 = vrsqrt.f32 %v3084_v58  ;;  %vm1678_vm11 = vcmp.eq.f32.partialorder %v3082_v35, inf  ;;  %v1600_v57 = vpop.xlane.xlu0 %1599 }
 0x1d0   : > { %v3089_v20 = vadd.f32 1e-06, %v1582_v49  ;;  %v1997_v3 = vadd.f32 %v1996_v2, %v1995_v31  ;;  %v1681_v36 = vand.u32 2147483648, %v3082_v35  ;;  %v1895_v53 = vsel %vm1894_vm7, %v1675_v39, 0.0 }
 0x1d1   : > { %v1898_v9 = vsel %vm1894_vm7, %v1689_v46, 0.0  ;;  %vm1680_vm12 = vcmp.eq.f32.partialorder %v3082_v35, 0.0  ;;  %v1696_v6 = vsel %vm1694_vm10, %v1695_v7, %v1693_v42  ;;  %v1707_v43 = vsel %vm1706_vm13, %v3079_v41, %v1705_v1 }
 0x1d2   : > { %2192 = vrsqrt.f32 %v3089_v20  ;;  %1998 = vadd.xlane.f32.xlu0 %v1997_v3  ;;  %vm1699_vm14 = vcmp.eq.f32.partialorder %v3089_v20, inf  ;;  %v1702_v32 = vand.u32 2147483648, %v3089_v20  ;;  %vm1701_vm15 = vcmp.eq.f32.partialorder %v3089_v20, 0.0 }
 0x1d3   : > { %v1586_v24 = vpop.xlane.xlu1 %1585  ;;  %v1900_v44 = vsel %vm1894_vm7, %v1696_v6, 0.0  ;;  %v1710_v4 = vsel %vm1708_vm0, %v1709_v29, %v1707_v43  ;;  %v1723_v49 = vand.u32 2147483648, %v3084_v58  ;;  %vm1722_vm4 = vcmp.eq.f32.partialorder %v3084_v58, 0.0  ;;  %v1604_v39 = vpop.xlane.xlu0 %1603 }
 0x1d4   : > { %v3093_v17 = vadd.f32 1e-06, %v1586_v24  ;;  %v1904_v28 = vsel %vm1894_vm7, %v1710_v4, 0.0  ;;  %v3149_v38 = vadd.f32 1e-06, %v1600_v57  ;;  %vm1734_vm6 = vcmp.eq.f32.partialorder %v3096_v21, inf }
 0x1d5   : > { %v1737_v42 = vand.u32 2147483648, %v3096_v21  ;;  %vm1736_vm9 = vcmp.eq.f32.partialorder %v3096_v21, 0.0  ;;  %v3167_v7 = vadd.f32 1e-06, %v1604_v39  ;;  %vm1750_vm13 = vcmp.eq.f32.partialorder %v3121_v47, 0.0 }
 0x1d6   : > { %2194 = vrsqrt.f32 %v3093_v17  ;;  %vm1713_vm2 = vcmp.eq.f32.partialorder %v3093_v17, inf  ;;  %v1716_v15 = vand.u32 2147483648, %v3093_v17  ;;  %vm1715_vm3 = vcmp.eq.f32.partialorder %v3093_v17, 0.0 }
 0x1d7   : > { %v1590_v11 = vpop.xlane.xlu1 %1589  ;;  %2196 = vrsqrt.f32 %v3096_v21 }
 0x1d8   : > { %v2189_v23 = vpop.eup %2188  ;;  %v3101_v51 = vadd.f32 1e-06, %v1590_v11 }
 0x1d9   : > { %v1677_v26 = vmul.f32 %v2189_v23, %v3082_v35  ;;  %v2191_v34 = vpop.eup %2190 }
 0x1da   : > { %2198 = vrsqrt.f32 %v3101_v51  ;;  %v1719_v60 = vmul.f32 %v2191_v34, %v3084_v58  ;;  %vm1727_vm5 = vcmp.eq.f32.partialorder %v3101_v51, inf  ;;  %vm1729_vm8 = vcmp.eq.f32.partialorder %v3101_v51, 0.0 }
 0x1db   : > { %v1679_v52 = vsel %vm1678_vm11, %v3082_v35, %v1677_v26  ;;  %v1594_v25 = vpop.xlane.xlu1 %1593  ;;  %vm1748_vm11 = vcmp.eq.f32.partialorder %v3121_v47, inf }
 0x1dc   : > { %v2193_v50 = vpop.eup %2192  ;;  %v1682_v63 = vsel %vm1680_vm12, %v1681_v36, %v1679_v52  ;;  %v3118_v18 = vadd.f32 1e-06, %v1594_v25  ;;  %v1721_v35 = vsel %vm1720_vm1, %v3084_v58, %v1719_v60  ;;  %v1730_v58 = vand.u32 2147483648, %v3101_v51  ;;  %v1608_v25 = vpop.xlane.xlu0 %1607 }
 0x1dd   : > { %v1896_v16 = vsel %vm1894_vm7, %v1682_v63, 0.0  ;;  %v1698_v14 = vmul.f32 %v2193_v50, %v3089_v20  ;;  %v1724_v3 = vsel %vm1722_vm4, %v1723_v49, %v1721_v35  ;;  %vm1764_vm1 = vcmp.eq.f32.partialorder %v3149_v38, 0.0 }
 0x1de   : > { %v1897_v59 = vadd.f32 %v1896_v16, %v1895_v53  ;;  %2200 = vrsqrt.f32 %v3118_v18  ;;  %v1908_v13 = vsel %vm1894_vm7, %v1724_v3, 0.0  ;;  %vm1741_vm10 = vcmp.eq.f32.partialorder %v3118_v18, inf }
 0x1df   : > { %v1700_v48 = vsel %vm1699_vm14, %v3089_v20, %v1698_v14  ;;  %v1598_v62 = vpop.xlane.xlu1 %1597  ;;  %2202 = vrsqrt.f32 %v3121_v47  ;;  %v1744_v52 = vand.u32 2147483648, %v3118_v18  ;;  %vm1743_vm12 = vcmp.eq.f32.partialorder %v3118_v18, 0.0 }
 0x1e0   : > { %v2195_v55 = vpop.eup %2194  ;;  %v1899_v40 = vadd.f32 %v1898_v9, %v1897_v59  ;;  %v1703_v54 = vsel %vm1701_vm15, %v1702_v32, %v1700_v48  ;;  %v3143_v45 = vadd.f32 1e-06, %v1598_v62  ;;  %v1751_v14 = vand.u32 2147483648, %v3121_v47  ;;  %v1612_v62 = vpop.xlane.xlu0 %1611 }
 0x1e1   : > { %v1712_v61 = vmul.f32 %v2195_v55, %v3093_v17  ;;  %v2197_v22 = vpop.eup %2196  ;;  %v1902_v41 = vsel %vm1894_vm7, %v1703_v54, 0.0  ;;  %v3185_v59 = vadd.f32 1e-06, %v1608_v25  ;;  %vm1762_vm15 = vcmp.eq.f32.partialorder %v3149_v38, inf }
 0x1e2   : > { %v1901_v8 = vadd.f32 %v1900_v44, %v1899_v40  ;;  %v1733_v33 = vmul.f32 %v2197_v22, %v3096_v21  ;;  %2204 = vrsqrt.f32 %v3143_v45  ;;  %vm1755_vm14 = vcmp.eq.f32.partialorder %v3143_v45, inf }
 0x1e3   : > { %v1714_v5 = vsel %vm1713_vm2, %v3093_v17, %v1712_v61  ;;  %v1602_v12 = vpop.xlane.xlu1 %1601  ;;  %2206 = vrsqrt.f32 %v3149_v38  ;;  %vm1757_vm0 = vcmp.eq.f32.partialorder %v3143_v45, 0.0  ;;  %v1765_v22 = vand.u32 2147483648, %v3149_v38 }
 0x1e4   : > { %v2199_v37 = vpop.eup %2198  ;;  %v1903_v31 = vadd.f32 %v1902_v41, %v1901_v8  ;;  %v1717_v2 = vsel %vm1715_vm3, %v1716_v15, %v1714_v5  ;;  %v1735_v10 = vsel %vm1734_vm6, %v3096_v21, %v1733_v33  ;;  %v3162_v46 = vadd.f32 1e-06, %v1602_v12  ;;  %v1616_v12 = vpop.xlane.xlu0 %1615 }
 0x1e5   : > { %v1726_v20 = vmul.f32 %v2199_v37, %v3101_v51  ;;  %v1906_v24 = vsel %vm1894_vm7, %v1717_v2, 0.0  ;;  %v1738_v26 = vsel %vm1736_vm9, %v1737_v42, %v1735_v10  ;;  %v3203_v41 = vadd.f32 1e-06, %v1612_v62 }
 0x1e6   : > { %v1905_v19 = vadd.f32 %v1904_v28, %v1903_v31  ;;  %2208 = vrsqrt.f32 %v3162_v46  ;;  %v1912_v21 = vsel %vm1894_vm7, %v1738_v26, 0.0  ;;  %vm1769_vm2 = vcmp.eq.f32.partialorder %v3162_v46, inf }
 0x1e7   : > { %v1728_v17 = vsel %vm1727_vm5, %v3101_v51, %v1726_v20  ;;  %v1606_v53 = vpop.xlane.xlu1 %1605  ;;  %2210 = vrsqrt.f32 %v3167_v7  ;;  %v1772_v20 = vand.u32 2147483648, %v3162_v46  ;;  %vm1776_vm3 = vcmp.eq.f32.partialorder %v3167_v7, inf }
 0x1e8   : > { %v1907_v0 = vadd.f32 %v1906_v24, %v1905_v19  ;;  %v2201_v30 = vpop.eup %2200  ;;  %v1731_v11 = vsel %vm1729_vm8, %v1730_v58, %v1728_v17  ;;  %v3180_v43 = vadd.f32 1e-06, %v1606_v53  ;;  %vm1771_vm4 = vcmp.eq.f32.partialorder %v3162_v46, 0.0 }
 0x1e9   : > { %v2203_v56 = vpop.eup %2202  ;;  %v1740_v1 = vmul.f32 %v2201_v30, %v3118_v18  ;;  %v1910_v27 = vsel %vm1894_vm7, %v1731_v11, 0.0  ;;  %v1779_v17 = vand.u32 2147483648, %v3167_v7  ;;  %vm1778_vm5 = vcmp.eq.f32.partialorder %v3167_v7, 0.0 }
 0x1ea   : > { %v1909_v23 = vadd.f32 %v1908_v13, %v1907_v0  ;;  %v1747_v51 = vmul.f32 %v2203_v56, %v3121_v47  ;;  %2212 = vrsqrt.f32 %v3180_v43  ;;  %v3223_v10 = vadd.f32 1e-06, %v1616_v12 }
 0x1eb   : > { %v1742_v34 = vsel %vm1741_vm10, %v3118_v18, %v1740_v1  ;;  %v1610_v44 = vpop.xlane.xlu1 %1609  ;;  %2214 = vrsqrt.f32 %v3185_v59  ;;  %vm1783_vm6 = vcmp.eq.f32.partialorder %v3180_v43, inf  ;;  %vm1790_vm8 = vcmp.eq.f32.partialorder %v3185_v59, inf }
 0x1ec   : > { %v1911_v36 = vadd.f32 %v1910_v27, %v1909_v23  ;;  %v2205_v9 = vpop.eup %2204  ;;  %v1749_v50 = vsel %vm1748_vm11, %v3121_v47, %v1747_v51  ;;  %v1745_v6 = vsel %vm1743_vm12, %v1744_v52, %v1742_v34  ;;  %v1758_v47 = vand.u32 2147483648, %v3143_v45 }
 0x1ed   : > { %v2207_v16 = vpop.eup %2206  ;;  %v1754_v60 = vmul.f32 %v2205_v9, %v3143_v45  ;;  %v1752_v32 = vsel %vm1750_vm13, %v1751_v14, %v1749_v50  ;;  %v1914_v29 = vsel %vm1894_vm7, %v1745_v6, 0.0  ;;  %v3198_v8 = vadd.f32 1e-06, %v1610_v44  ;;  %v1620_v9 = vpop.xlane.xlu0 %1619 }
 0x1ee   : > { %v1913_v63 = vadd.f32 %v1912_v21, %v1911_v36  ;;  %v1761_v18 = vmul.f32 %v2207_v16, %v3149_v38  ;;  %v1916_v54 = vsel %vm1894_vm7, %v1752_v32, 0.0  ;;  %v1786_v42 = vand.u32 2147483648, %v3180_v43 }
 0x1ef   : > { %v1756_v55 = vsel %vm1755_vm14, %v3143_v45, %v1754_v60  ;;  %2216 = vrsqrt.f32 %v3198_v8  ;;  %v1614_v2 = vpop.xlane.xlu1 %1613  ;;  %vm1785_vm9 = vcmp.eq.f32.partialorder %v3180_v43, 0.0  ;;  %v1793_v34 = vand.u32 2147483648, %v3185_v59 }
 0x1f0   : > { %v1915_v48 = vadd.f32 %v1914_v29, %v1913_v63  ;;  %v2209_v40 = vpop.eup %2208  ;;  %v1763_v4 = vsel %vm1762_vm15, %v3149_v38, %v1761_v18  ;;  %v1759_v61 = vsel %vm1757_vm0, %v1758_v47, %v1756_v55  ;;  %2218 = vrsqrt.f32 %v3203_v41 }
 0x1f1   : > { %v2211_v15 = vpop.eup %2210  ;;  %v1768_v57 = vmul.f32 %v2209_v40, %v3162_v46  ;;  %v1766_v5 = vsel %vm1764_vm1, %v1765_v22, %v1763_v4  ;;  %v1918_v37 = vsel %vm1894_vm7, %v1759_v61, 0.0  ;;  %v3216_v0 = vadd.f32 1e-06, %v1614_v2 }
 0x1f2   : > { %v1917_v35 = vadd.f32 %v1916_v54, %v1915_v48  ;;  %v1775_v45 = vmul.f32 %v2211_v15, %v3167_v7  ;;  %v1920_v3 = vsel %vm1894_vm7, %v1766_v5, 0.0  ;;  %vm1792_vm10 = vcmp.eq.f32.partialorder %v3185_v59, 0.0 }
 0x1f3   : > { %v1770_v31 = vsel %vm1769_vm2, %v3162_v46, %v1768_v57  ;;  %2220 = vrsqrt.f32 %v3216_v0  ;;  %v1618_v23 = vpop.xlane.xlu1 %1617  ;;  %vm1797_vm11 = vcmp.eq.f32.partialorder %v3198_v8, inf  ;;  %v3242_v6 = vadd.f32 1e-06, %v1620_v9 }
 0x1f4   : > { %v1919_v49 = vadd.f32 %v1918_v37, %v1917_v35  ;;  %v2213_v28 = vpop.eup %2212  ;;  %v1777_v19 = vsel %vm1776_vm3, %v3167_v7, %v1775_v45  ;;  %v1773_v33 = vsel %vm1771_vm4, %v1772_v20, %v1770_v31  ;;  %2222 = vrsqrt.f32 %v3223_v10  ;;  %v1624_v18 = vpop.xlane.xlu0 %1623 }
 0x1f5   : > { %v2215_v38 = vpop.eup %2214  ;;  %v1782_v30 = vmul.f32 %v2213_v28, %v3180_v43  ;;  %v1780_v58 = vsel %vm1778_vm5, %v1779_v17, %v1777_v19  ;;  %v1922_v56 = vsel %vm1894_vm7, %v1773_v33, 0.0  ;;  %v3234_v36 = vadd.f32 1e-06, %v1618_v23 }
 0x1f6   : > { %v1921_v24 = vadd.f32 %v1920_v3, %v1919_v49  ;;  %v1789_v13 = vmul.f32 %v2215_v38, %v3185_v59  ;;  %v1924_v1 = vsel %vm1894_vm7, %v1780_v58, 0.0  ;;  %vm1804_vm12 = vcmp.eq.f32.partialorder %v3203_v41, inf }
 0x1f7   : > { %v1784_v11 = vsel %vm1783_vm6, %v3180_v43, %v1782_v30  ;;  %2224 = vrsqrt.f32 %v3234_v36  ;;  %v1622_v43 = vpop.xlane.xlu1 %1621  ;;  %v1800_v14 = vand.u32 2147483648, %v3198_v8  ;;  %vm1799_vm13 = vcmp.eq.f32.partialorder %v3198_v8, 0.0 }
 0x1f8   : > { %v1923_v39 = vadd.f32 %v1922_v56, %v1921_v24  ;;  %v1791_v26 = vsel %vm1790_vm8, %v3185_v59, %v1789_v13  ;;  %v1787_v27 = vsel %vm1785_vm9, %v1786_v42, %v1784_v11  ;;  %2226 = vrsqrt.f32 %v3242_v6 }
 0x1f9   : > { %v2217_v46 = vpop.eup %2216  ;;  %v1794_v52 = vsel %vm1792_vm10, %v1793_v34, %v1791_v26  ;;  %v1926_v25 = vsel %vm1894_vm7, %v1787_v27, 0.0  ;;  %v3252_v48 = vadd.f32 1e-06, %v1622_v43  ;;  %v1807_v55 = vand.u32 2147483648, %v3203_v41 }
 0x1fa   : > { %v2219_v7 = vpop.eup %2218  ;;  %v1925_v51 = vadd.f32 %v1924_v1, %v1923_v39  ;;  %v1796_v53 = vmul.f32 %v2217_v46, %v3198_v8  ;;  %v1928_v60 = vsel %vm1894_vm7, %v1794_v52, 0.0  ;;  %vm1806_vm14 = vcmp.eq.f32.partialorder %v3203_v41, 0.0 }
 0x1fb   : > { %v1803_v21 = vmul.f32 %v2219_v7, %v3203_v41  ;;  %vm1811_vm15 = vcmp.eq.f32.partialorder %v3216_v0, inf  ;;  %v3259_v61 = vadd.f32 1e-06, %v1624_v18  ;;  %2228 = vrsqrt.f32 %v3252_v48 }
 0x1fc   : > { %v1927_v50 = vadd.f32 %v1926_v25, %v1925_v51  ;;  %v1798_v63 = vsel %vm1797_vm11, %v3198_v8, %v1796_v53  ;;  %vm1813_vm0 = vcmp.eq.f32.partialorder %v3216_v0, 0.0  ;;  %vm1818_vm1 = vcmp.eq.f32.partialorder %v3223_v10, inf }
 0x1fd   : > { %v2221_v16 = vpop.eup %2220  ;;  %v1805_v59 = vsel %vm1804_vm12, %v3203_v41, %v1803_v21  ;;  %v1801_v32 = vsel %vm1799_vm13, %v1800_v14, %v1798_v63  ;;  %v1814_v41 = vand.u32 2147483648, %v3216_v0  ;;  %2230 = vrsqrt.f32 %v3259_v61 }
 0x1fe   : > { %v1929_v29 = vadd.f32 %v1928_v60, %v1927_v50  ;;  %v1810_v44 = vmul.f32 %v2221_v16, %v3216_v0  ;;  %v2223_v40 = vpop.eup %2222  ;;  %v1808_v54 = vsel %vm1806_vm14, %v1807_v55, %v1805_v59  ;;  %v1930_v62 = vsel %vm1894_vm7, %v1801_v32, 0.0 }
 0x1ff   : > { %v1817_v8 = vmul.f32 %v2223_v40, %v3223_v10  ;;  %v1932_v5 = vsel %vm1894_vm7, %v1808_v54, 0.0  ;;  %v1821_v38 = vand.u32 2147483648, %v3223_v10  ;;  %vm1820_vm2 = vcmp.eq.f32.partialorder %v3223_v10, 0.0 }
 0x200   : > { %v1931_v4 = vadd.f32 %v1930_v62, %v1929_v29  ;;  %v1812_v15 = vsel %vm1811_vm15, %v3216_v0, %v1810_v44  ;;  %vm1825_vm3 = vcmp.eq.f32.partialorder %v3234_v36, inf  ;;  %v1828_v58 = vand.u32 2147483648, %v3234_v36 }
 0x201   : > { %v2225_v57 = vpop.eup %2224  ;;  %v1815_v45 = vsel %vm1813_vm0, %v1814_v41, %v1812_v15  ;;  %v1819_v2 = vsel %vm1818_vm1, %v3223_v10, %v1817_v8  ;;  %vm1827_vm4 = vcmp.eq.f32.partialorder %v3234_v36, 0.0  ;;  %vm1832_vm5 = vcmp.eq.f32.partialorder %v3242_v6, inf }
 0x202   : > { %v1933_v49 = vadd.f32 %v1932_v5, %v1931_v4  ;;  %v1824_v28 = vmul.f32 %v2225_v57, %v3234_v36  ;;  %v2227_v3 = vpop.eup %2226  ;;  %v1934_v19 = vsel %vm1894_vm7, %v1815_v45, 0.0  ;;  %v1822_v24 = vsel %vm1820_vm2, %v1821_v38, %v1819_v2 }
 0x203   : > { %v1831_v17 = vmul.f32 %v2227_v3, %v3242_v6  ;;  %v1936_v56 = vsel %vm1894_vm7, %v1822_v24, 0.0  ;;  %v1835_v26 = vand.u32 2147483648, %v3242_v6  ;;  %vm1834_vm6 = vcmp.eq.f32.partialorder %v3242_v6, 0.0 }
 0x204   : > { %v1935_v0 = vadd.f32 %v1934_v19, %v1933_v49  ;;  %v1826_v12 = vsel %vm1825_vm3, %v3234_v36, %v1824_v28  ;;  %vm1839_vm8 = vcmp.eq.f32.partialorder %v3252_v48, inf  ;;  %v1842_v52 = vand.u32 2147483648, %v3252_v48 }
 0x205   : > { %v2229_v30 = vpop.eup %2228  ;;  %v1829_v39 = vsel %vm1827_vm4, %v1828_v58, %v1826_v12  ;;  %v1833_v46 = vsel %vm1832_vm5, %v3242_v6, %v1831_v17  ;;  %vm1841_vm9 = vcmp.eq.f32.partialorder %v3252_v48, 0.0  ;;  %vm1846_vm10 = vcmp.eq.f32.partialorder %v3259_v61, inf }
 0x206   : > { %v1626_v47 = vpop.xlane.xlu1 %1625  ;;  %v1937_v23 = vadd.f32 %v1936_v56, %v1935_v0  ;;  %v1838_v42 = vmul.f32 %v2229_v30, %v3252_v48  ;;  %v1938_v27 = vsel %vm1894_vm7, %v1829_v39, 0.0  ;;  %v1836_v51 = vsel %vm1834_vm6, %v1835_v26, %v1833_v46 }
 0x207   : > { %v3264_v22 = vadd.f32 1e-06, %v1626_v47  ;;  %v2231_v1 = vpop.eup %2230  ;;  %v1940_v50 = vsel %vm1894_vm7, %v1836_v51, 0.0  ;;  %v1849_v14 = vand.u32 2147483648, %v3259_v61  ;;  %vm1848_vm12 = vcmp.eq.f32.partialorder %v3259_v61, 0.0 }
 0x208   : > { %v1939_v36 = vadd.f32 %v1938_v27, %v1937_v23  ;;  %v1845_v53 = vmul.f32 %v2231_v1, %v3259_v61  ;;  %v1840_v9 = vsel %vm1839_vm8, %v3252_v48, %v1838_v42 }
 0x209   : > { %2232 = vrsqrt.f32 %v3264_v22  ;;  %v1843_v63 = vsel %vm1841_vm9, %v1842_v52, %v1840_v9  ;;  %vm1853_vm11 = vcmp.eq.f32.partialorder %v3264_v22, inf  ;;  %v1856_v32 = vand.u32 2147483648, %v3264_v22 }
 0x20a   : > { %v1941_v43 = vadd.f32 %v1940_v50, %v1939_v36  ;;  %v1847_v16 = vsel %vm1846_vm10, %v3259_v61, %v1845_v53  ;;  %v1942_v29 = vsel %vm1894_vm7, %v1843_v63, 0.0  ;;  %vm1855_vm14 = vcmp.eq.f32.partialorder %v3264_v22, 0.0 }
 0x20b   : > { %v1850_v55 = vsel %vm1848_vm12, %v1849_v14, %v1847_v16  ;;  %vm218_vm9 = vcmask 0  }
 0x20c   : > { %v1943_v40 = vadd.f32 %v1942_v29, %v1941_v43  ;;  %v1944_v15 = vsel %vm1894_vm7, %v1850_v55, 0.0 }
 0x20e   : > { %v1945_v45 = vadd.f32 %v1944_v15, %v1943_v40 }
 0x210   : > { %v1628_v35 = vpop.xlane.xlu0 %1627 }
 0x211   : > { %v3269_v37 = vadd.f32 1e-06, %v1628_v35 }
 0x213   : > { %2234 = vrsqrt.f32 %v3269_v37  ;;  %v2233_v7 = vpop.eup %2232  ;;  %vm1860_vm13 = vcmp.eq.f32.partialorder %v3269_v37, inf  ;;  %v1863_v4 = vand.u32 2147483648, %v3269_v37  ;;  %vm1862_vm0 = vcmp.eq.f32.partialorder %v3269_v37, 0.0 }
 0x214   : > { %v1852_v21 = vmul.f32 %v2233_v7, %v3264_v22 }
 0x216   : > { %v1854_v59 = vsel %vm1853_vm11, %v3264_v22, %v1852_v21 }
 0x217   : > { %v1632_v33 = vpop.xlane.xlu0 %1631  ;;  %v1857_v62 = vsel %vm1855_vm14, %v1856_v32, %v1854_v59 }
 0x218   : > { %v3287_v13 = vadd.f32 1e-06, %v1632_v33  ;;  %v1946_v41 = vsel %vm1894_vm7, %v1857_v62, 0.0 }
 0x219   : > { %v1947_v49 = vadd.f32 %v1946_v41, %v1945_v45 }
 0x21a   : > { %v1630_v31 = vpop.xlane.xlu1 %1629  ;;  %vm1874_vm2 = vcmp.eq.f32.partialorder %v3287_v13, inf  ;;  %vm1876_vm4 = vcmp.eq.f32.partialorder %v3287_v13, 0.0 }
 0x21b   : > { %v3276_v20 = vadd.f32 1e-06, %v1630_v31 }
 0x21d   : > { %2236 = vrsqrt.f32 %v3276_v20  ;;  %v2235_v34 = vpop.eup %2234  ;;  %vm1867_vm15 = vcmp.eq.f32.partialorder %v3276_v20, inf  ;;  %v1870_v8 = vand.u32 2147483648, %v3276_v20  ;;  %vm1869_vm1 = vcmp.eq.f32.partialorder %v3276_v20, 0.0 }
 0x21e   : > { %2238 = vrsqrt.f32 %v3287_v13  ;;  %v1859_v6 = vmul.f32 %v2235_v34, %v3269_v37 }
 0x220   : > { %v1861_v44 = vsel %vm1860_vm13, %v3269_v37, %v1859_v6 }
 0x221   : > { %v1634_v10 = vpop.xlane.xlu1 %1633  ;;  %v1864_v35 = vsel %vm1862_vm0, %v1863_v4, %v1861_v44 }
 0x222   : > { %v3292_v11 = vadd.f32 1e-06, %v1634_v10  ;;  %v1948_v37 = vsel %vm1894_vm7, %v1864_v35, 0.0 }
 0x223   : > { %v1949_v38 = vadd.f32 %v1948_v37, %v1947_v49 }
 0x224   : > { %2240 = vrsqrt.f32 %v3292_v11  ;;  %vm1881_vm3 = vcmp.eq.f32.partialorder %v3292_v11, inf  ;;  %v1884_v3 = vand.u32 2147483648, %v3292_v11  ;;  %vm1883_vm5 = vcmp.eq.f32.partialorder %v3292_v11, 0.0 }
 0x227   : > { %v2237_v25 = vpop.eup %2236 }
 0x228   : > { %v1866_v60 = vmul.f32 %v2237_v25, %v3276_v20  ;;  %v2239_v18 = vpop.eup %2238 }
 0x229   : > { %v1873_v22 = vmul.f32 %v2239_v18, %v3287_v13 }
 0x22a   : > { %v1868_v61 = vsel %vm1867_vm15, %v3276_v20, %v1866_v60  ;;  %v1877_v20 = vand.u32 2147483648, %v3287_v13 }
 0x22b   : > { %v1871_v5 = vsel %vm1869_vm1, %v1870_v8, %v1868_v61  ;;  %v1875_v31 = vsel %vm1874_vm2, %v3287_v13, %v1873_v22 }
 0x22c   : > { %v1950_v28 = vsel %vm1894_vm7, %v1871_v5, 0.0  ;;  %v1878_v19 = vsel %vm1876_vm4, %v1877_v20, %v1875_v31 }
 0x22d   : > { %v1951_v24 = vadd.f32 %v1950_v28, %v1949_v38  ;;  %v1952_v12 = vsel %vm1894_vm7, %v1878_v19, 0.0 }
 0x22e   : > { %v2241_v47 = vpop.eup %2240 }
 0x22f   : > { %v1636_v48 = vpop.xlane.xlu0 %1635  ;;  %v1880_v57 = vmul.f32 %v2241_v47, %v3292_v11  ;;  %v1953_v56 = vadd.f32 %v1952_v12, %v1951_v24 }
 0x230   : > { %v1668_v54 = vadd.f32 1e-06, %v1636_v48 }
 0x231   : > { %v1882_v2 = vsel %vm1881_vm3, %v3292_v11, %v1880_v57  ;;  %v2272_v11 = vmov 0.0  }
 0x232   : > { %2242 = vrsqrt.f32 %v1668_v54  ;;  %v1885_v33 = vsel %vm1883_vm5, %v1884_v3, %v1882_v2  ;;  %vm1888_vm6 = vcmp.eq.f32.partialorder %v1668_v54, inf  ;;  %v1891_v58 = vand.u32 2147483648, %v1668_v54  ;;  %219 = vst.msk [vmem:[#allocation4] sm:$0x1] %vm218_vm9, %v2272_v11 }
 0x233   : > { %v1954_v30 = vsel %vm1894_vm7, %v1885_v33, 0.0  ;;  %vm1890_vm8 = vcmp.eq.f32.partialorder %v1668_v54, 0.0 }
 0x234   : > { %v1955_v23 = vadd.f32 %v1954_v30, %v1953_v56 }
 0x239   : > { %v1893_v6 = vld [vmem:[#allocation4] sm:$0x1] }
 0x23c   : > { %v2243_v0 = vpop.eup %2242 }
 0x23d   : > { %v1887_v17 = vmul.f32 %v2243_v0, %v1668_v54 }
 0x23f   : > { %v1889_v10 = vsel %vm1888_vm6, %v1668_v54, %v1887_v17 }
 0x240   : > { %v1892_v39 = vsel %vm1890_vm8, %v1891_v58, %v1889_v10 }
 0x241   : > { %v1956_v13 = vsel %vm1894_vm7, %v1892_v39, 0.0 }
 0x242   : > { %v1957_v46 = vadd.f32 %v1956_v13, %v1955_v23 }
 0x244   : > { %1958 = vadd.xlane.f32.xlu1 %v1957_v46 }
 0x25f   : > { %v1999_v42 = vpop.xlane.xlu0 %1998 }
 0x260   : > { %v2000_v1 = vrot.slane %v1999_v42, 4 }
 0x262   : > { %v2001_v26 = vadd.f32 %v2000_v1, %v1999_v42 }
 0x264   : > { %v2002_v7 = vrot.slane %v2001_v26, 2 }
 0x266   : > { %v2003_v34 = vadd.f32 %v2002_v7, %v2001_v26 }
 0x268   : > { %v2004_v52 = vrot.slane %v2003_v34, 1 }
 0x26a   : > { %v2005_v50 = vadd.f32 %v2004_v52, %v2003_v34 }
 0x2d1   : > { %v1959_v27 = vpop.xlane.xlu1 %1958 }
 0x2d2   : > { %v1960_v51 = vrot.slane %v1959_v27, 4 }
 0x2d4   : > { %v1961_v36 = vadd.f32 %v1960_v51, %v1959_v27 }
 0x2d6   : > { %v1962_v53 = vrot.slane %v1961_v36, 2 }
 0x2d8   : > { %v1963_v9 = vadd.f32 %v1962_v53, %v1961_v36 }
 0x2da   : > { %v1964_v21 = vrot.slane %v1963_v9, 1 }
 0x2dc   : > { %v1965_v25 = vadd.f32 %v1964_v21, %v1963_v9 }
 0x2de   : > { %2108 = vpush %v1965_v25 }
 0x2df   : > { %2110 = vpush %v2005_v50 }
 0x30f   : > { %s2109_s21 = spop %2108 }
 0x310   : > { %v1967_v63 = vstv %s2109_s21  ;;  %s2111_s22 = spop %2110 }
 0x311   : > { %v1968_v43 = vadd.f32 %v1967_v63, %v1893_v6  ;;  %v2007_v14 = vstv %s2111_s22 }
 0x313   : > { %1970 = vst.msk [vmem:[#allocation4] sm:$0x1] %vm218_vm9, %v1968_v43 }
 0x31a   : > { %v1982_v16 = vld [vmem:[#allocation4] sm:$0x1] }
 0x31b   : > { %v2008_v60 = vadd.f32 %v2007_v14, %v1982_v16 }
 0x31d   : > { %2010 = vst.msk [vmem:[%s210_s25] sm:$0x1] %vm218_vm9, %v2008_v60 }
 0x31e PF: > { %s12_s11 = sadd.s32 1, %s2266_s11   ;;  %s3437_s9 = smov %s2262_s10 }
 0x31f   : > { %p9_p5 = scmp.ge.s32.totalorder %s12_s11, 4   ;;  %s3438_s10 = smov %s3440_s12 }
 0x321   :  { %11 = sbr.rel (!%p9_p5) target bundleno = 2 (0x2), region = 91 }

</bundles_post_ra>
